<compile_context>
chip_gen: v5e
topology: v5e:2x2
jax: 0.10.0
libtpu: 0.0.40
codegen_flags: <defaults>
</compile_context>

<pallas_src>
import functools

import jax
import jax.numpy as jnp
from jax.experimental import pallas as pl
from jax.experimental.pallas import tpu as pltpu

COMPUTE_DTYPE = jnp.bfloat16   # MXU input dtype; accumulation is always f32.
LANE = 128


# ----------------------------------------------------------------------------
# small helpers
# ----------------------------------------------------------------------------
def _round_up(n, m):
    return (n + m - 1) // m * m


def _row_tiles(m, max_tm=512):
    """Row tile (multiple of 8, capped) and padded row count."""
    tm = min(max_tm, _round_up(m, 8))
    return tm, _round_up(m, tm)


def _pad_to(a, shape):
    return jnp.pad(a, [(0, t - s) for s, t in zip(a.shape, shape)])


# ----------------------------------------------------------------------------
# Pallas kernels
# ----------------------------------------------------------------------------
def _gemm_bias_kernel(x_ref, w_ref, b_ref, o_ref, *, apply_relu):
    """o = relu?(x @ w + b).  x:(TM,K) bf16, w:(K,N) bf16, b:(1,N) f32, o:(TM,N) f32."""
    y = jnp.dot(x_ref[...], w_ref[...], preferred_element_type=jnp.float32)
    y = y + b_ref[...]
    if apply_relu:
        y = jnp.maximum(y, 0.0)
    o_ref[...] = y.astype(o_ref.dtype)


def _max4_kernel(a_ref, b_ref, c_ref, d_ref, o_ref):
    """Elementwise max over the 4 shifted views of a 2x2 pooling window."""
    o_ref[...] = jnp.maximum(
        jnp.maximum(a_ref[...], b_ref[...]),
        jnp.maximum(c_ref[...], d_ref[...]),
    )


def _fused_mlp_kernel(x_ref, w1_ref, b1_ref, w2_ref, b2_ref, w3_ref, b3_ref, o_ref):
    """relu(relu(x@w1+b1)@w2+b2)@w3+b3 — all three FC layers in one kernel."""
    h = jnp.dot(x_ref[...], w1_ref[...], preferred_element_type=jnp.float32) + b1_ref[...]
    h = jnp.maximum(h, 0.0).astype(w2_ref.dtype)
    h = jnp.dot(h, w2_ref[...], preferred_element_type=jnp.float32) + b2_ref[...]
    h = jnp.maximum(h, 0.0).astype(w3_ref.dtype)
    y = jnp.dot(h, w3_ref[...], preferred_element_type=jnp.float32) + b3_ref[...]
    o_ref[...] = y.astype(o_ref.dtype)


# ----------------------------------------------------------------------------
# Pallas wrappers
# ----------------------------------------------------------------------------
def pallas_gemm_bias(x, w, b, apply_relu):
    """x:(M,K), w:(K,N), b:(N,). K and N must already be multiples of 128."""
    M, K = x.shape
    K2, N = w.shape
    assert K == K2 and K % LANE == 0 and N % LANE == 0
    tm, Mp = _row_tiles(M, max_tm=512)
    if Mp != M:
        x = jnp.pad(x, ((0, Mp - M), (0, 0)))
    b2 = b.reshape(1, N).astype(jnp.float32)

    cost = pl.CostEstimate(
        flops=2 * Mp * K * N,
        transcendentals=0,
        bytes_accessed=Mp * K * x.dtype.itemsize
        + K * N * w.dtype.itemsize
        + Mp * N * 4,
    )
    out = pl.pallas_call(
        functools.partial(_gemm_bias_kernel, apply_relu=apply_relu),
        out_shape=jax.ShapeDtypeStruct((Mp, N), jnp.float32),
        grid=(Mp // tm,),
        in_specs=[
            pl.BlockSpec((tm, K), lambda i: (i, 0)),
            pl.BlockSpec((K, N), lambda i: (0, 0)),
            pl.BlockSpec((1, N), lambda i: (0, 0)),
        ],
        out_specs=pl.BlockSpec((tm, N), lambda i: (i, 0)),
        compiler_params=pltpu.CompilerParams(dimension_semantics=("parallel",)),
        cost_estimate=cost,
    )(x, w, b2)
    return out[:M]


def pallas_maxpool2x2_nhwc(x):
    """x:(B,H,W,C) NHWC (C = 128 lane-dense) -> (B,H//2,W//2,C)."""
    B, H, W, C = x.shape
    OH, OW = H // 2, W // 2
    M = B * OH * OW
    views = [x[:, hp::2, wp::2, :].reshape(M, C) for hp in (0, 1) for wp in (0, 1)]
    tm, Mp = _row_tiles(M, max_tm=512)
    if Mp != M:
        views = [jnp.pad(v, ((0, Mp - M), (0, 0))) for v in views]
    spec = pl.BlockSpec((tm, C), lambda i: (i, 0))
    out = pl.pallas_call(
        _max4_kernel,
        out_shape=jax.ShapeDtypeStruct((Mp, C), x.dtype),
        grid=(Mp // tm,),
        in_specs=[spec, spec, spec, spec],
        out_specs=spec,
        compiler_params=pltpu.CompilerParams(dimension_semantics=("parallel",)),
    )(*views)
    return out[:M].reshape(B, OH, OW, C)


def conv2d_relu_nhwc(x, w, b):
    """Conv2d (stride 1, no pad) + ReLU.  x NHWC (B,H,W,IC); w torch layout
    (OC,IC,KH,KW).  Returns (B,OH,OW,128) f32; channels >= OC are zero."""
    B, H, W, C = x.shape
    OC, IC, KH, KW = w.shape
    assert C == IC
    OH, OW = H - KH + 1, W - KW + 1
    K = KH * KW * IC
    Kp = _round_up(K, LANE)
    Np = _round_up(OC, LANE)

    # im2col in NHWC: column order (kh, kw, ic), ic fastest — no transposes.
    xc = x.astype(COMPUTE_DTYPE)
    cols = [xc[:, kh:kh + OH, kw:kw + OW, :] for kh in range(KH) for kw in range(KW)]
    if Kp != K:
        cols.append(jnp.zeros((B, OH, OW, Kp - K), COMPUTE_DTYPE))
    patches = jnp.concatenate(cols, axis=-1).reshape(B * OH * OW, Kp)

    # weight (OC,IC,KH,KW) -> (KH,KW,IC,OC) -> (K,OC), zero-padded to (Kp,Np).
    w2 = jnp.transpose(w, (2, 3, 1, 0)).reshape(K, OC)
    w2 = _pad_to(w2, (Kp, Np)).astype(COMPUTE_DTYPE)
    bp = _pad_to(b, (Np,))

    y = pallas_gemm_bias(patches, w2, bp, apply_relu=True)      # (B*OH*OW, Np) f32
    return y.reshape(B, OH, OW, Np)


def pallas_fused_mlp(x, params):
    """x:(B,400) f32 -> (B,10) f32; fc1+relu+fc2+relu+fc3 in a single kernel."""
    B, K = x.shape
    Kp = _round_up(K, LANE)                                      # 512
    w1 = _pad_to(params["fc1_w"], (Kp, LANE)).astype(COMPUTE_DTYPE)
    b1 = _pad_to(params["fc1_b"], (LANE,)).reshape(1, LANE).astype(jnp.float32)
    w2 = _pad_to(params["fc2_w"], (LANE, LANE)).astype(COMPUTE_DTYPE)
    b2 = _pad_to(params["fc2_b"], (LANE,)).reshape(1, LANE).astype(jnp.float32)
    w3 = _pad_to(params["fc3_w"], (LANE, LANE)).astype(COMPUTE_DTYPE)
    b3 = _pad_to(params["fc3_b"], (LANE,)).reshape(1, LANE).astype(jnp.float32)

    tm, Mp = _row_tiles(B, max_tm=256)
    xp = _pad_to(x, (Mp, Kp)).astype(COMPUTE_DTYPE)

    full = lambda shape: pl.BlockSpec(shape, lambda i: (0, 0))
    out = pl.pallas_call(
        _fused_mlp_kernel,
        out_shape=jax.ShapeDtypeStruct((Mp, LANE), jnp.float32),
        grid=(Mp // tm,),
        in_specs=[
            pl.BlockSpec((tm, Kp), lambda i: (i, 0)),
            full((Kp, LANE)), full((1, LANE)),
            full((LANE, LANE)), full((1, LANE)),
            full((LANE, LANE)), full((1, LANE)),
        ],
        out_specs=pl.BlockSpec((tm, LANE), lambda i: (i, 0)),
        compiler_params=pltpu.CompilerParams(dimension_semantics=("parallel",)),
    )(xp, w1, b1, w2, b2, w3, b3)
    return out[:B, :10]


# ----------------------------------------------------------------------------
# Model: parameters + forward
# ----------------------------------------------------------------------------
def init_params(key):
    def uniform(key, shape, fan_in):
        bound = 1.0 / jnp.sqrt(float(fan_in))
        return jax.random.uniform(key, shape, jnp.float32, -bound, bound)

    ks = jax.random.split(key, 10)
    p = {}
    p["conv1_w"] = uniform(ks[0], (6, 3, 5, 5), 3 * 5 * 5)
    p["conv1_b"] = uniform(ks[1], (6,), 3 * 5 * 5)
    p["conv2_w"] = uniform(ks[2], (16, 6, 5, 5), 6 * 5 * 5)
    p["conv2_b"] = uniform(ks[3], (16,), 6 * 5 * 5)
    p["fc1_w"] = uniform(ks[4], (16 * 5 * 5, 120), 16 * 5 * 5)
    p["fc1_b"] = uniform(ks[5], (120,), 16 * 5 * 5)
    p["fc2_w"] = uniform(ks[6], (120, 84), 120)
    p["fc2_b"] = uniform(ks[7], (84,), 120)
    p["fc3_w"] = uniform(ks[8], (84, 10), 84)
    p["fc3_b"] = uniform(ks[9], (10,), 84)
    return p


@jax.jit
def cnn_forward(params, x):
    # x: (B, 3, 32, 32) NCHW float32 (PyTorch convention)
    x = jnp.transpose(x, (0, 2, 3, 1))                               # NHWC (B,32,32,3)
    x = conv2d_relu_nhwc(x, params["conv1_w"], params["conv1_b"])    # (B,28,28,128)
    x = pallas_maxpool2x2_nhwc(x)                                    # (B,14,14,128)
    x = x[..., :6]                                                   # real channels
    x = conv2d_relu_nhwc(x, params["conv2_w"], params["conv2_b"])    # (B,10,10,128)
    x = pallas_maxpool2x2_nhwc(x)                                    # (B,5,5,128)
    x = x[..., :16]                                                  # (B,5,5,16)
    B = x.shape[0]
    # NCHW flatten (C,H,W order) to match torch .view(-1, 16*5*5)
    x = jnp.transpose(x, (0, 3, 1, 2)).reshape(B, 16 * 5 * 5)
    return pallas_fused_mlp(x, params)                               # (B,10)


if __name__ == "__main__":
    key = jax.random.PRNGKey(0)
    pkey, xkey = jax.random.split(key)
    params = init_params(pkey)
    x = jax.random.normal(xkey, (2, 3, 32, 32), jnp.float32)         # small batch, CIFAR-sized
    out = cnn_forward(params, x)
    out = jax.block_until_ready(out)
    assert out.shape == (2, 10), out.shape
    print("KERNEL_OK")
</pallas_src>

<mosaic_0001>
module attributes {stable_mosaic.version = 11 : i64} {
  func.func @_gemm_bias_kernel(%arg0: i32, %arg1: memref<512x128xbf16, #tpu.memory_space<vmem>>, %arg2: memref<128x128xbf16, #tpu.memory_space<vmem>>, %arg3: memref<1x128xf32, #tpu.memory_space<vmem>>, %arg4: memref<512x128xf32, #tpu.memory_space<vmem>>) attributes {dimension_semantics = [#tpu.dimension_semantics<parallel>], iteration_bounds = array<i64: 4>, scalar_prefetch = 0 : i64, scratch_operands = 0 : i64, tpu.core_type = #tpu.core_type<tc>, window_params = [{transform_indices = @transform_0, window_bounds = array<i64: 512, 128>}, {pipeline_mode = #tpu.pipeline_mode<synchronous>, transform_indices = @transform_1, window_bounds = array<i64: 128, 128>}, {pipeline_mode = #tpu.pipeline_mode<synchronous>, transform_indices = @transform_2, window_bounds = array<i64: 1, 128>}, {transform_indices = @transform_3, window_bounds = array<i64: 512, 128>}]} {
    %c0 = arith.constant 0 : index
    %c0_0 = arith.constant 0 : index
    %0 = vector.load %arg1[%c0, %c0_0] : memref<512x128xbf16, #tpu.memory_space<vmem>>, vector<512x128xbf16>
    %c0_1 = arith.constant 0 : index
    %c0_2 = arith.constant 0 : index
    %1 = vector.load %arg2[%c0_1, %c0_2] : memref<128x128xbf16, #tpu.memory_space<vmem>>, vector<128x128xbf16>
    %cst = arith.constant dense<0.000000e+00> : vector<512x128xf32>
    %2 = tpu.matmul %0, %1, %cst {dimension_numbers = #tpu.dot_dimension_numbers<[1], [0], [0], [1], [0, 0, 1, 1], [], []>} : vector<512x128xbf16>, vector<128x128xbf16>, vector<512x128xf32> -> vector<512x128xf32>
    %c0_3 = arith.constant 0 : index
    %c0_4 = arith.constant 0 : index
    %3 = vector.load %arg3[%c0_3, %c0_4] : memref<1x128xf32, #tpu.memory_space<vmem>>, vector<1x128xf32>
    %4 = vector.broadcast %3 : vector<1x128xf32> to vector<512x128xf32>
    %5 = arith.addf %2, %4 : vector<512x128xf32>
    %cst_5 = arith.constant 0.000000e+00 : f32
    %6 = vector.broadcast %cst_5 : f32 to vector<512x128xf32>
    %7 = arith.maximumf %5, %6 : vector<512x128xf32>
    %c0_6 = arith.constant 0 : index
    %c0_7 = arith.constant 0 : index
    %8 = vector.load %arg4[%c0_6, %c0_7] : memref<512x128xf32, #tpu.memory_space<vmem>>, vector<512x128xf32>
    tpu.vector_store %arg4[%c0_6, %c0_7], %7 {strides = array<i32>} : memref<512x128xf32, #tpu.memory_space<vmem>>, vector<512x128xf32>,
    return
  }
  func.func @transform_0(%arg0: i32) -> (i32, i32) {
    %c0_i32 = arith.constant 0 : i32
    %c0_i32_0 = arith.constant 0 : i32
    return %arg0, %c0_i32 : i32, i32
  }
  func.func @transform_1(%arg0: i32) -> (i32, i32) {
    %c0_i32 = arith.constant 0 : i32
    %c0_i32_0 = arith.constant 0 : i32
    %c0_i32_1 = arith.constant 0 : i32
    return %c0_i32, %c0_i32_0 : i32, i32
  }
  func.func @transform_2(%arg0: i32) -> (i32, i32) {
    %c0_i32 = arith.constant 0 : i32
    %c0_i32_0 = arith.constant 0 : i32
    %c0_i32_1 = arith.constant 0 : i32
    return %c0_i32, %c0_i32_0 : i32, i32
  }
  func.func @transform_3(%arg0: i32) -> (i32, i32) {
    %c0_i32 = arith.constant 0 : i32
    %c0_i32_0 = arith.constant 0 : i32
    return %arg0, %c0_i32 : i32, i32
  }
}

module attributes {stable_mosaic.version = 11 : i64} {
  func.func @_max4_kernel(%arg0: i32, %arg1: memref<392x128xf32, #tpu.memory_space<vmem>>, %arg2: memref<392x128xf32, #tpu.memory_space<vmem>>, %arg3: memref<392x128xf32, #tpu.memory_space<vmem>>, %arg4: memref<392x128xf32, #tpu.memory_space<vmem>>, %arg5: memref<392x128xf32, #tpu.memory_space<vmem>>) attributes {dimension_semantics = [#tpu.dimension_semantics<parallel>], iteration_bounds = array<i64: 1>, scalar_prefetch = 0 : i64, scratch_operands = 0 : i64, tpu.core_type = #tpu.core_type<tc>, window_params = [{transform_indices = @transform_0, window_bounds = array<i64: 392, 128>}, {transform_indices = @transform_1, window_bounds = array<i64: 392, 128>}, {transform_indices = @transform_2, window_bounds = array<i64: 392, 128>}, {transform_indices = @transform_3, window_bounds = array<i64: 392, 128>}, {transform_indices = @transform_4, window_bounds = array<i64: 392, 128>}]} {
    %c0 = arith.constant 0 : index
    %c0_0 = arith.constant 0 : index
    %0 = vector.load %arg1[%c0, %c0_0] : memref<392x128xf32, #tpu.memory_space<vmem>>, vector<392x128xf32>
    %c0_1 = arith.constant 0 : index
    %c0_2 = arith.constant 0 : index
    %1 = vector.load %arg2[%c0_1, %c0_2] : memref<392x128xf32, #tpu.memory_space<vmem>>, vector<392x128xf32>
    %2 = arith.maximumf %0, %1 : vector<392x128xf32>
    %c0_3 = arith.constant 0 : index
    %c0_4 = arith.constant 0 : index
    %3 = vector.load %arg3[%c0_3, %c0_4] : memref<392x128xf32, #tpu.memory_space<vmem>>, vector<392x128xf32>
    %c0_5 = arith.constant 0 : index
    %c0_6 = arith.constant 0 : index
    %4 = vector.load %arg4[%c0_5, %c0_6] : memref<392x128xf32, #tpu.memory_space<vmem>>, vector<392x128xf32>
    %5 = arith.maximumf %3, %4 : vector<392x128xf32>
    %6 = arith.maximumf %2, %5 : vector<392x128xf32>
    %c0_7 = arith.constant 0 : index
    %c0_8 = arith.constant 0 : index
    %7 = vector.load %arg5[%c0_7, %c0_8] : memref<392x128xf32, #tpu.memory_space<vmem>>, vector<392x128xf32>
    tpu.vector_store %arg5[%c0_7, %c0_8], %6 {strides = array<i32>} : memref<392x128xf32, #tpu.memory_space<vmem>>, vector<392x128xf32>,
    return
  }
  func.func @transform_0(%arg0: i32) -> (i32, i32) {
    %c0_i32 = arith.constant 0 : i32
    %c0_i32_0 = arith.constant 0 : i32
    return %arg0, %c0_i32 : i32, i32
  }
  func.func @transform_1(%arg0: i32) -> (i32, i32) {
    %c0_i32 = arith.constant 0 : i32
    %c0_i32_0 = arith.constant 0 : i32
    return %arg0, %c0_i32 : i32, i32
  }
  func.func @transform_2(%arg0: i32) -> (i32, i32) {
    %c0_i32 = arith.constant 0 : i32
    %c0_i32_0 = arith.constant 0 : i32
    return %arg0, %c0_i32 : i32, i32
  }
  func.func @transform_3(%arg0: i32) -> (i32, i32) {
    %c0_i32 = arith.constant 0 : i32
    %c0_i32_0 = arith.constant 0 : i32
    return %arg0, %c0_i32 : i32, i32
  }
  func.func @transform_4(%arg0: i32) -> (i32, i32) {
    %c0_i32 = arith.constant 0 : i32
    %c0_i32_0 = arith.constant 0 : i32
    return %arg0, %c0_i32 : i32, i32
  }
}

module attributes {stable_mosaic.version = 11 : i64} {
  func.func @_gemm_bias_kernel(%arg0: i32, %arg1: memref<200x256xbf16, #tpu.memory_space<vmem>>, %arg2: memref<256x128xbf16, #tpu.memory_space<vmem>>, %arg3: memref<1x128xf32, #tpu.memory_space<vmem>>, %arg4: memref<200x128xf32, #tpu.memory_space<vmem>>) attributes {dimension_semantics = [#tpu.dimension_semantics<parallel>], iteration_bounds = array<i64: 1>, scalar_prefetch = 0 : i64, scratch_operands = 0 : i64, tpu.core_type = #tpu.core_type<tc>, window_params = [{transform_indices = @transform_0, window_bounds = array<i64: 200, 256>}, {pipeline_mode = #tpu.pipeline_mode<synchronous>, transform_indices = @transform_1, window_bounds = array<i64: 256, 128>}, {pipeline_mode = #tpu.pipeline_mode<synchronous>, transform_indices = @transform_2, window_bounds = array<i64: 1, 128>}, {transform_indices = @transform_3, window_bounds = array<i64: 200, 128>}]} {
    %c0 = arith.constant 0 : index
    %c0_0 = arith.constant 0 : index
    %0 = vector.load %arg1[%c0, %c0_0] : memref<200x256xbf16, #tpu.memory_space<vmem>>, vector<200x256xbf16>
    %c0_1 = arith.constant 0 : index
    %c0_2 = arith.constant 0 : index
    %1 = vector.load %arg2[%c0_1, %c0_2] : memref<256x128xbf16, #tpu.memory_space<vmem>>, vector<256x128xbf16>
    %cst = arith.constant dense<0.000000e+00> : vector<200x128xf32>
    %2 = tpu.matmul %0, %1, %cst {dimension_numbers = #tpu.dot_dimension_numbers<[1], [0], [0], [1], [0, 0, 1, 1], [], []>} : vector<200x256xbf16>, vector<256x128xbf16>, vector<200x128xf32> -> vector<200x128xf32>
    %c0_3 = arith.constant 0 : index
    %c0_4 = arith.constant 0 : index
    %3 = vector.load %arg3[%c0_3, %c0_4] : memref<1x128xf32, #tpu.memory_space<vmem>>, vector<1x128xf32>
    %4 = vector.broadcast %3 : vector<1x128xf32> to vector<200x128xf32>
    %5 = arith.addf %2, %4 : vector<200x128xf32>
    %cst_5 = arith.constant 0.000000e+00 : f32
    %6 = vector.broadcast %cst_5 : f32 to vector<200x128xf32>
    %7 = arith.maximumf %5, %6 : vector<200x128xf32>
    %c0_6 = arith.constant 0 : index
    %c0_7 = arith.constant 0 : index
    %8 = vector.load %arg4[%c0_6, %c0_7] : memref<200x128xf32, #tpu.memory_space<vmem>>, vector<200x128xf32>
    tpu.vector_store %arg4[%c0_6, %c0_7], %7 {strides = array<i32>} : memref<200x128xf32, #tpu.memory_space<vmem>>, vector<200x128xf32>,
    return
  }
  func.func @transform_0(%arg0: i32) -> (i32, i32) {
    %c0_i32 = arith.constant 0 : i32
    %c0_i32_0 = arith.constant 0 : i32
    return %arg0, %c0_i32 : i32, i32
  }
  func.func @transform_1(%arg0: i32) -> (i32, i32) {
    %c0_i32 = arith.constant 0 : i32
    %c0_i32_0 = arith.constant 0 : i32
    %c0_i32_1 = arith.constant 0 : i32
    return %c0_i32, %c0_i32_0 : i32, i32
  }
  func.func @transform_2(%arg0: i32) -> (i32, i32) {
    %c0_i32 = arith.constant 0 : i32
    %c0_i32_0 = arith.constant 0 : i32
    %c0_i32_1 = arith.constant 0 : i32
    return %c0_i32, %c0_i32_0 : i32, i32
  }
  func.func @transform_3(%arg0: i32) -> (i32, i32) {
    %c0_i32 = arith.constant 0 : i32
    %c0_i32_0 = arith.constant 0 : i32
    return %arg0, %c0_i32 : i32, i32
  }
}

module attributes {stable_mosaic.version = 11 : i64} {
  func.func @_max4_kernel(%arg0: i32, %arg1: memref<56x128xf32, #tpu.memory_space<vmem>>, %arg2: memref<56x128xf32, #tpu.memory_space<vmem>>, %arg3: memref<56x128xf32, #tpu.memory_space<vmem>>, %arg4: memref<56x128xf32, #tpu.memory_space<vmem>>, %arg5: memref<56x128xf32, #tpu.memory_space<vmem>>) attributes {dimension_semantics = [#tpu.dimension_semantics<parallel>], iteration_bounds = array<i64: 1>, scalar_prefetch = 0 : i64, scratch_operands = 0 : i64, tpu.core_type = #tpu.core_type<tc>, window_params = [{transform_indices = @transform_0, window_bounds = array<i64: 56, 128>}, {transform_indices = @transform_1, window_bounds = array<i64: 56, 128>}, {transform_indices = @transform_2, window_bounds = array<i64: 56, 128>}, {transform_indices = @transform_3, window_bounds = array<i64: 56, 128>}, {transform_indices = @transform_4, window_bounds = array<i64: 56, 128>}]} {
    %c0 = arith.constant 0 : index
    %c0_0 = arith.constant 0 : index
    %0 = vector.load %arg1[%c0, %c0_0] : memref<56x128xf32, #tpu.memory_space<vmem>>, vector<56x128xf32>
    %c0_1 = arith.constant 0 : index
    %c0_2 = arith.constant 0 : index
    %1 = vector.load %arg2[%c0_1, %c0_2] : memref<56x128xf32, #tpu.memory_space<vmem>>, vector<56x128xf32>
    %2 = arith.maximumf %0, %1 : vector<56x128xf32>
    %c0_3 = arith.constant 0 : index
    %c0_4 = arith.constant 0 : index
    %3 = vector.load %arg3[%c0_3, %c0_4] : memref<56x128xf32, #tpu.memory_space<vmem>>, vector<56x128xf32>
    %c0_5 = arith.constant 0 : index
    %c0_6 = arith.constant 0 : index
    %4 = vector.load %arg4[%c0_5, %c0_6] : memref<56x128xf32, #tpu.memory_space<vmem>>, vector<56x128xf32>
    %5 = arith.maximumf %3, %4 : vector<56x128xf32>
    %6 = arith.maximumf %2, %5 : vector<56x128xf32>
    %c0_7 = arith.constant 0 : index
    %c0_8 = arith.constant 0 : index
    %7 = vector.load %arg5[%c0_7, %c0_8] : memref<56x128xf32, #tpu.memory_space<vmem>>, vector<56x128xf32>
    tpu.vector_store %arg5[%c0_7, %c0_8], %6 {strides = array<i32>} : memref<56x128xf32, #tpu.memory_space<vmem>>, vector<56x128xf32>,
    return
  }
  func.func @transform_0(%arg0: i32) -> (i32, i32) {
    %c0_i32 = arith.constant 0 : i32
    %c0_i32_0 = arith.constant 0 : i32
    return %arg0, %c0_i32 : i32, i32
  }
  func.func @transform_1(%arg0: i32) -> (i32, i32) {
    %c0_i32 = arith.constant 0 : i32
    %c0_i32_0 = arith.constant 0 : i32
    return %arg0, %c0_i32 : i32, i32
  }
  func.func @transform_2(%arg0: i32) -> (i32, i32) {
    %c0_i32 = arith.constant 0 : i32
    %c0_i32_0 = arith.constant 0 : i32
    return %arg0, %c0_i32 : i32, i32
  }
  func.func @transform_3(%arg0: i32) -> (i32, i32) {
    %c0_i32 = arith.constant 0 : i32
    %c0_i32_0 = arith.constant 0 : i32
    return %arg0, %c0_i32 : i32, i32
  }
  func.func @transform_4(%arg0: i32) -> (i32, i32) {
    %c0_i32 = arith.constant 0 : i32
    %c0_i32_0 = arith.constant 0 : i32
    return %arg0, %c0_i32 : i32, i32
  }
}

module attributes {stable_mosaic.version = 11 : i64} {
  func.func @_fused_mlp_kernel(%arg0: i32, %arg1: memref<8x512xbf16, #tpu.memory_space<vmem>>, %arg2: memref<512x128xbf16, #tpu.memory_space<vmem>>, %arg3: memref<1x128xf32, #tpu.memory_space<vmem>>, %arg4: memref<128x128xbf16, #tpu.memory_space<vmem>>, %arg5: memref<1x128xf32, #tpu.memory_space<vmem>>, %arg6: memref<128x128xbf16, #tpu.memory_space<vmem>>, %arg7: memref<1x128xf32, #tpu.memory_space<vmem>>, %arg8: memref<8x128xf32, #tpu.memory_space<vmem>>) attributes {dimension_semantics = [#tpu.dimension_semantics<parallel>], iteration_bounds = array<i64: 1>, scalar_prefetch = 0 : i64, scratch_operands = 0 : i64, tpu.core_type = #tpu.core_type<tc>, window_params = [{transform_indices = @transform_0, window_bounds = array<i64: 8, 512>}, {pipeline_mode = #tpu.pipeline_mode<synchronous>, transform_indices = @transform_1, window_bounds = array<i64: 512, 128>}, {pipeline_mode = #tpu.pipeline_mode<synchronous>, transform_indices = @transform_2, window_bounds = array<i64: 1, 128>}, {pipeline_mode = #tpu.pipeline_mode<synchronous>, transform_indices = @transform_3, window_bounds = array<i64: 128, 128>}, {pipeline_mode = #tpu.pipeline_mode<synchronous>, transform_indices = @transform_4, window_bounds = array<i64: 1, 128>}, {pipeline_mode = #tpu.pipeline_mode<synchronous>, transform_indices = @transform_5, window_bounds = array<i64: 128, 128>}, {pipeline_mode = #tpu.pipeline_mode<synchronous>, transform_indices = @transform_6, window_bounds = array<i64: 1, 128>}, {transform_indices = @transform_7, window_bounds = array<i64: 8, 128>}]} {
    %c0 = arith.constant 0 : index
    %c0_0 = arith.constant 0 : index
    %0 = vector.load %arg1[%c0, %c0_0] : memref<8x512xbf16, #tpu.memory_space<vmem>>, vector<8x512xbf16>
    %c0_1 = arith.constant 0 : index
    %c0_2 = arith.constant 0 : index
    %1 = vector.load %arg2[%c0_1, %c0_2] : memref<512x128xbf16, #tpu.memory_space<vmem>>, vector<512x128xbf16>
    %cst = arith.constant dense<0.000000e+00> : vector<8x128xf32>
    %2 = tpu.matmul %0, %1, %cst {dimension_numbers = #tpu.dot_dimension_numbers<[1], [0], [0], [1], [0, 0, 1, 1], [], []>} : vector<8x512xbf16>, vector<512x128xbf16>, vector<8x128xf32> -> vector<8x128xf32>
    %c0_3 = arith.constant 0 : index
    %c0_4 = arith.constant 0 : index
    %3 = vector.load %arg3[%c0_3, %c0_4] : memref<1x128xf32, #tpu.memory_space<vmem>>, vector<1x128xf32>
    %4 = vector.broadcast %3 : vector<1x128xf32> to vector<8x128xf32>
    %5 = arith.addf %2, %4 : vector<8x128xf32>
    %cst_5 = arith.constant 0.000000e+00 : f32
    %6 = vector.broadcast %cst_5 : f32 to vector<8x128xf32>
    %7 = arith.maximumf %5, %6 : vector<8x128xf32>
    %8 = arith.truncf %7 : vector<8x128xf32> to vector<8x128xbf16>
    %c0_6 = arith.constant 0 : index
    %c0_7 = arith.constant 0 : index
    %9 = vector.load %arg4[%c0_6, %c0_7] : memref<128x128xbf16, #tpu.memory_space<vmem>>, vector<128x128xbf16>
    %cst_8 = arith.constant dense<0.000000e+00> : vector<8x128xf32>
    %10 = tpu.matmul %8, %9, %cst_8 {dimension_numbers = #tpu.dot_dimension_numbers<[1], [0], [0], [1], [0, 0, 1, 1], [], []>} : vector<8x128xbf16>, vector<128x128xbf16>, vector<8x128xf32> -> vector<8x128xf32>
    %c0_9 = arith.constant 0 : index
    %c0_10 = arith.constant 0 : index
    %11 = vector.load %arg5[%c0_9, %c0_10] : memref<1x128xf32, #tpu.memory_space<vmem>>, vector<1x128xf32>
    %12 = vector.broadcast %11 : vector<1x128xf32> to vector<8x128xf32>
    %13 = arith.addf %10, %12 : vector<8x128xf32>
    %cst_11 = arith.constant 0.000000e+00 : f32
    %14 = vector.broadcast %cst_11 : f32 to vector<8x128xf32>
    %15 = arith.maximumf %13, %14 : vector<8x128xf32>
    %16 = arith.truncf %15 : vector<8x128xf32> to vector<8x128xbf16>
    %c0_12 = arith.constant 0 : index
    %c0_13 = arith.constant 0 : index
    %17 = vector.load %arg6[%c0_12, %c0_13] : memref<128x128xbf16, #tpu.memory_space<vmem>>, vector<128x128xbf16>
    %cst_14 = arith.constant dense<0.000000e+00> : vector<8x128xf32>
    %18 = tpu.matmul %16, %17, %cst_14 {dimension_numbers = #tpu.dot_dimension_numbers<[1], [0], [0], [1], [0, 0, 1, 1], [], []>} : vector<8x128xbf16>, vector<128x128xbf16>, vector<8x128xf32> -> vector<8x128xf32>
    %c0_15 = arith.constant 0 : index
    %c0_16 = arith.constant 0 : index
    %19 = vector.load %arg7[%c0_15, %c0_16] : memref<1x128xf32, #tpu.memory_space<vmem>>, vector<1x128xf32>
    %20 = vector.broadcast %19 : vector<1x128xf32> to vector<8x128xf32>
    %21 = arith.addf %18, %20 : vector<8x128xf32>
    %c0_17 = arith.constant 0 : index
    %c0_18 = arith.constant 0 : index
    %22 = vector.load %arg8[%c0_17, %c0_18] : memref<8x128xf32, #tpu.memory_space<vmem>>, vector<8x128xf32>
    tpu.vector_store %arg8[%c0_17, %c0_18], %21 {strides = array<i32>} : memref<8x128xf32, #tpu.memory_space<vmem>>, vector<8x128xf32>,
    return
  }
  func.func @transform_0(%arg0: i32) -> (i32, i32) {
    %c0_i32 = arith.constant 0 : i32
    %c0_i32_0 = arith.constant 0 : i32
    return %arg0, %c0_i32 : i32, i32
  }
  func.func @transform_1(%arg0: i32) -> (i32, i32) {
    %c0_i32 = arith.constant 0 : i32
    %c0_i32_0 = arith.constant 0 : i32
    %c0_i32_1 = arith.constant 0 : i32
    return %c0_i32, %c0_i32_0 : i32, i32
  }
  func.func @transform_2(%arg0: i32) -> (i32, i32) {
    %c0_i32 = arith.constant 0 : i32
    %c0_i32_0 = arith.constant 0 : i32
    %c0_i32_1 = arith.constant 0 : i32
    return %c0_i32, %c0_i32_0 : i32, i32
  }
  func.func @transform_3(%arg0: i32) -> (i32, i32) {
    %c0_i32 = arith.constant 0 : i32
    %c0_i32_0 = arith.constant 0 : i32
    %c0_i32_1 = arith.constant 0 : i32
    return %c0_i32, %c0_i32_0 : i32, i32
  }
  func.func @transform_4(%arg0: i32) -> (i32, i32) {
    %c0_i32 = arith.constant 0 : i32
    %c0_i32_0 = arith.constant 0 : i32
    %c0_i32_1 = arith.constant 0 : i32
    return %c0_i32, %c0_i32_0 : i32, i32
  }
  func.func @transform_5(%arg0: i32) -> (i32, i32) {
    %c0_i32 = arith.constant 0 : i32
    %c0_i32_0 = arith.constant 0 : i32
    %c0_i32_1 = arith.constant 0 : i32
    return %c0_i32, %c0_i32_0 : i32, i32
  }
  func.func @transform_6(%arg0: i32) -> (i32, i32) {
    %c0_i32 = arith.constant 0 : i32
    %c0_i32_0 = arith.constant 0 : i32
    %c0_i32_1 = arith.constant 0 : i32
    return %c0_i32, %c0_i32_0 : i32, i32
  }
  func.func @transform_7(%arg0: i32) -> (i32, i32) {
    %c0_i32 = arith.constant 0 : i32
    %c0_i32_0 = arith.constant 0 : i32
    return %arg0, %c0_i32 : i32, i32
  }
}

</mosaic_0001>

<bundles_post_ra>
// kernel: cnn_forward.6
= control target key start
LH: loop header
LB: loop body
LE: loop exit
PB: predicated region body
PF: predicated region fallthrough
CT: control target
= control target key end

     0   :  { %s1173_s0 = inlined_call_operand.vmem [shape: f32[392,128], index: 0, kind: input, shape index: {}]   ;;  %s1174_s1 = inlined_call_operand.vmem [shape: f32[392,128], index: 1, kind: input, shape index: {}]   ;;  %s1175_s2 = inlined_call_operand.vmem [shape: f32[392,128], index: 2, kind: input, shape index: {}]   ;;  %s1176_s3 = inlined_call_operand.vmem [shape: f32[392,128], index: 3, kind: input, shape index: {}]   ;;  %s1177_s4 = inlined_call_operand.vmem [shape: f32[392,128], index: 4, kind: output, shape index: {}]  }
   0x1   :  { %v17_v0 = vld [vmem:[%s1173_s0] sm:$0xff]  ;;  %v18_v5 = vld [vmem:[%s1173_s0 + $0x8] sm:$0xff]  ;;  %v19_v11 = vld [vmem:[%s1173_s0 + $0x10] sm:$0xff] }
   0x2   :  { %v66_v1 = vld [vmem:[%s1174_s1] sm:$0xff]  ;;  %v67_v6 = vld [vmem:[%s1174_s1 + $0x8] sm:$0xff]  ;;  %v68_v13 = vld [vmem:[%s1174_s1 + $0x10] sm:$0xff] }
   0x3   :  { %v164_v2 = vld [vmem:[%s1175_s2] sm:$0xff]  ;;  %v115_v3 = vmax.f32 %v17_v0, %v66_v1  ;;  %v116_v8 = vmax.f32 %v18_v5, %v67_v6  ;;  %v165_v9 = vld [vmem:[%s1175_s2 + $0x8] sm:$0xff]  ;;  %v166_v14 = vld [vmem:[%s1175_s2 + $0x10] sm:$0xff]  ;;  %v117_v17 = vmax.f32 %v19_v11, %v68_v13 }
   0x4   :  { %v213_v4 = vld [vmem:[%s1176_s3] sm:$0xff]  ;;  %v214_v10 = vld [vmem:[%s1176_s3 + $0x8] sm:$0xff]  ;;  %v215_v15 = vld [vmem:[%s1176_s3 + $0x10] sm:$0xff] }
   0x5   :  { %v262_v7 = vmax.f32 %v164_v2, %v213_v4  ;;  %v263_v12 = vmax.f32 %v165_v9, %v214_v10  ;;  %v264_v18 = vmax.f32 %v166_v14, %v215_v15  ;;  %v20_v19 = vld [vmem:[%s1173_s0 + $0x18] sm:$0xff]  ;;  %v21_v25 = vld [vmem:[%s1173_s0 + $0x20] sm:$0xff]  ;;  %v22_v32 = vld [vmem:[%s1173_s0 + $0x28] sm:$0xff] }
   0x6   :  { %v69_v20 = vld [vmem:[%s1174_s1 + $0x18] sm:$0xff]  ;;  %v70_v26 = vld [vmem:[%s1174_s1 + $0x20] sm:$0xff]  ;;  %v71_v34 = vld [vmem:[%s1174_s1 + $0x28] sm:$0xff] }
   0x7   :  { %v311_v16 = vmax.f32 %v115_v3, %v262_v7  ;;  %v167_v21 = vld [vmem:[%s1175_s2 + $0x18] sm:$0xff]  ;;  %v312_v22 = vmax.f32 %v116_v8, %v263_v12  ;;  %v118_v23 = vmax.f32 %v20_v19, %v69_v20  ;;  %v313_v27 = vmax.f32 %v117_v17, %v264_v18  ;;  %v168_v30 = vld [vmem:[%s1175_s2 + $0x20] sm:$0xff]  ;;  %v169_v35 = vld [vmem:[%s1175_s2 + $0x28] sm:$0xff] }
   0x8   :  { %v216_v24 = vld [vmem:[%s1176_s3 + $0x18] sm:$0xff]  ;;  %v119_v29 = vmax.f32 %v21_v25, %v70_v26  ;;  %v217_v31 = vld [vmem:[%s1176_s3 + $0x20] sm:$0xff]  ;;  %v218_v36 = vld [vmem:[%s1176_s3 + $0x28] sm:$0xff]  ;;  %v120_v38 = vmax.f32 %v22_v32, %v71_v34 }
   0x9   :  { %360 = vst [vmem:[%s1177_s4] sm:$0xff] %v311_v16  ;;  %v265_v28 = vmax.f32 %v167_v21, %v216_v24  ;;  %v266_v33 = vmax.f32 %v168_v30, %v217_v31  ;;  %v267_v39 = vmax.f32 %v169_v35, %v218_v36  ;;  %v23_v40 = vld [vmem:[%s1173_s0 + $0x30] sm:$0xff]  ;;  %v24_v46 = vld [vmem:[%s1173_s0 + $0x38] sm:$0xff]  ;;  %v25_v53 = vld [vmem:[%s1173_s0 + $0x40] sm:$0xff] }
   0xa   :  { %361 = vst [vmem:[%s1177_s4 + $0x8] sm:$0xff] %v312_v22  ;;  %v72_v41 = vld [vmem:[%s1174_s1 + $0x30] sm:$0xff]  ;;  %v73_v47 = vld [vmem:[%s1174_s1 + $0x38] sm:$0xff]  ;;  %v74_v55 = vld [vmem:[%s1174_s1 + $0x40] sm:$0xff] }
   0xb   :  { %362 = vst [vmem:[%s1177_s4 + $0x10] sm:$0xff] %v313_v27  ;;  %v314_v37 = vmax.f32 %v118_v23, %v265_v28  ;;  %v170_v42 = vld [vmem:[%s1175_s2 + $0x30] sm:$0xff]  ;;  %v315_v43 = vmax.f32 %v119_v29, %v266_v33  ;;  %v121_v44 = vmax.f32 %v23_v40, %v72_v41  ;;  %v316_v48 = vmax.f32 %v120_v38, %v267_v39  ;;  %v171_v51 = vld [vmem:[%s1175_s2 + $0x38] sm:$0xff]  ;;  %v172_v56 = vld [vmem:[%s1175_s2 + $0x40] sm:$0xff] }
   0xc   :  { %v219_v45 = vld [vmem:[%s1176_s3 + $0x30] sm:$0xff]  ;;  %v122_v50 = vmax.f32 %v24_v46, %v73_v47  ;;  %v220_v52 = vld [vmem:[%s1176_s3 + $0x38] sm:$0xff]  ;;  %v221_v57 = vld [vmem:[%s1176_s3 + $0x40] sm:$0xff]  ;;  %v123_v59 = vmax.f32 %v25_v53, %v74_v55 }
   0xd   :  { %363 = vst [vmem:[%s1177_s4 + $0x18] sm:$0xff] %v314_v37  ;;  %v268_v49 = vmax.f32 %v170_v42, %v219_v45  ;;  %v269_v54 = vmax.f32 %v171_v51, %v220_v52  ;;  %v270_v60 = vmax.f32 %v172_v56, %v221_v57  ;;  %v26_v61 = vld [vmem:[%s1173_s0 + $0x48] sm:$0xff]  ;;  %v27_v3 = vld [vmem:[%s1173_s0 + $0x50] sm:$0xff]  ;;  %v28_v10 = vld [vmem:[%s1173_s0 + $0x58] sm:$0xff] }
   0xe   :  { %364 = vst [vmem:[%s1177_s4 + $0x20] sm:$0xff] %v315_v43  ;;  %v75_v62 = vld [vmem:[%s1174_s1 + $0x48] sm:$0xff]  ;;  %v76_v4 = vld [vmem:[%s1174_s1 + $0x50] sm:$0xff]  ;;  %v77_v12 = vld [vmem:[%s1174_s1 + $0x58] sm:$0xff] }
   0xf   :  { %365 = vst [vmem:[%s1177_s4 + $0x28] sm:$0xff] %v316_v48  ;;  %v317_v58 = vmax.f32 %v121_v44, %v268_v49  ;;  %v173_v63 = vld [vmem:[%s1175_s2 + $0x48] sm:$0xff]  ;;  %v318_v0 = vmax.f32 %v122_v50, %v269_v54  ;;  %v124_v1 = vmax.f32 %v26_v61, %v75_v62  ;;  %v319_v5 = vmax.f32 %v123_v59, %v270_v60  ;;  %v174_v8 = vld [vmem:[%s1175_s2 + $0x50] sm:$0xff]  ;;  %v175_v13 = vld [vmem:[%s1175_s2 + $0x58] sm:$0xff] }
  0x10   :  { %v222_v2 = vld [vmem:[%s1176_s3 + $0x48] sm:$0xff]  ;;  %v125_v7 = vmax.f32 %v27_v3, %v76_v4  ;;  %v223_v9 = vld [vmem:[%s1176_s3 + $0x50] sm:$0xff]  ;;  %v224_v14 = vld [vmem:[%s1176_s3 + $0x58] sm:$0xff]  ;;  %v126_v16 = vmax.f32 %v28_v10, %v77_v12 }
  0x11   :  { %366 = vst [vmem:[%s1177_s4 + $0x30] sm:$0xff] %v317_v58  ;;  %v271_v6 = vmax.f32 %v173_v63, %v222_v2  ;;  %v272_v11 = vmax.f32 %v174_v8, %v223_v9  ;;  %v273_v17 = vmax.f32 %v175_v13, %v224_v14  ;;  %v29_v18 = vld [vmem:[%s1173_s0 + $0x60] sm:$0xff]  ;;  %v30_v24 = vld [vmem:[%s1173_s0 + $0x68] sm:$0xff]  ;;  %v31_v31 = vld [vmem:[%s1173_s0 + $0x70] sm:$0xff] }
  0x12   :  { %367 = vst [vmem:[%s1177_s4 + $0x38] sm:$0xff] %v318_v0  ;;  %v78_v19 = vld [vmem:[%s1174_s1 + $0x60] sm:$0xff]  ;;  %v79_v25 = vld [vmem:[%s1174_s1 + $0x68] sm:$0xff]  ;;  %v80_v33 = vld [vmem:[%s1174_s1 + $0x70] sm:$0xff] }
  0x13   :  { %368 = vst [vmem:[%s1177_s4 + $0x40] sm:$0xff] %v319_v5  ;;  %v320_v15 = vmax.f32 %v124_v1, %v271_v6  ;;  %v176_v20 = vld [vmem:[%s1175_s2 + $0x60] sm:$0xff]  ;;  %v321_v21 = vmax.f32 %v125_v7, %v272_v11  ;;  %v127_v22 = vmax.f32 %v29_v18, %v78_v19  ;;  %v322_v26 = vmax.f32 %v126_v16, %v273_v17  ;;  %v177_v29 = vld [vmem:[%s1175_s2 + $0x68] sm:$0xff]  ;;  %v178_v34 = vld [vmem:[%s1175_s2 + $0x70] sm:$0xff] }
  0x14   :  { %v225_v23 = vld [vmem:[%s1176_s3 + $0x60] sm:$0xff]  ;;  %v128_v28 = vmax.f32 %v30_v24, %v79_v25  ;;  %v226_v30 = vld [vmem:[%s1176_s3 + $0x68] sm:$0xff]  ;;  %v227_v35 = vld [vmem:[%s1176_s3 + $0x70] sm:$0xff]  ;;  %v129_v37 = vmax.f32 %v31_v31, %v80_v33 }
  0x15   :  { %369 = vst [vmem:[%s1177_s4 + $0x48] sm:$0xff] %v320_v15  ;;  %v274_v27 = vmax.f32 %v176_v20, %v225_v23  ;;  %v275_v32 = vmax.f32 %v177_v29, %v226_v30  ;;  %v276_v38 = vmax.f32 %v178_v34, %v227_v35  ;;  %v32_v39 = vld [vmem:[%s1173_s0 + $0x78] sm:$0xff]  ;;  %v33_v45 = vld [vmem:[%s1173_s0 + $0x80] sm:$0xff]  ;;  %v34_v52 = vld [vmem:[%s1173_s0 + $0x88] sm:$0xff] }
  0x16   :  { %370 = vst [vmem:[%s1177_s4 + $0x50] sm:$0xff] %v321_v21  ;;  %v81_v40 = vld [vmem:[%s1174_s1 + $0x78] sm:$0xff]  ;;  %v82_v46 = vld [vmem:[%s1174_s1 + $0x80] sm:$0xff]  ;;  %v83_v54 = vld [vmem:[%s1174_s1 + $0x88] sm:$0xff] }
  0x17   :  { %371 = vst [vmem:[%s1177_s4 + $0x58] sm:$0xff] %v322_v26  ;;  %v323_v36 = vmax.f32 %v127_v22, %v274_v27  ;;  %v179_v41 = vld [vmem:[%s1175_s2 + $0x78] sm:$0xff]  ;;  %v324_v42 = vmax.f32 %v128_v28, %v275_v32  ;;  %v130_v43 = vmax.f32 %v32_v39, %v81_v40  ;;  %v325_v47 = vmax.f32 %v129_v37, %v276_v38  ;;  %v180_v50 = vld [vmem:[%s1175_s2 + $0x80] sm:$0xff]  ;;  %v181_v55 = vld [vmem:[%s1175_s2 + $0x88] sm:$0xff] }
  0x18   :  { %v228_v44 = vld [vmem:[%s1176_s3 + $0x78] sm:$0xff]  ;;  %v131_v49 = vmax.f32 %v33_v45, %v82_v46  ;;  %v229_v51 = vld [vmem:[%s1176_s3 + $0x80] sm:$0xff]  ;;  %v230_v56 = vld [vmem:[%s1176_s3 + $0x88] sm:$0xff]  ;;  %v132_v58 = vmax.f32 %v34_v52, %v83_v54 }
  0x19   :  { %372 = vst [vmem:[%s1177_s4 + $0x60] sm:$0xff] %v323_v36  ;;  %v277_v48 = vmax.f32 %v179_v41, %v228_v44  ;;  %v278_v53 = vmax.f32 %v180_v50, %v229_v51  ;;  %v279_v59 = vmax.f32 %v181_v55, %v230_v56  ;;  %v35_v60 = vld [vmem:[%s1173_s0 + $0x90] sm:$0xff]  ;;  %v36_v2 = vld [vmem:[%s1173_s0 + $0x98] sm:$0xff]  ;;  %v37_v9 = vld [vmem:[%s1173_s0 + $0xa0] sm:$0xff] }
  0x1a   :  { %373 = vst [vmem:[%s1177_s4 + $0x68] sm:$0xff] %v324_v42  ;;  %v84_v61 = vld [vmem:[%s1174_s1 + $0x90] sm:$0xff]  ;;  %v85_v3 = vld [vmem:[%s1174_s1 + $0x98] sm:$0xff]  ;;  %v86_v11 = vld [vmem:[%s1174_s1 + $0xa0] sm:$0xff] }
  0x1b   :  { %374 = vst [vmem:[%s1177_s4 + $0x70] sm:$0xff] %v325_v47  ;;  %v326_v57 = vmax.f32 %v130_v43, %v277_v48  ;;  %v182_v62 = vld [vmem:[%s1175_s2 + $0x90] sm:$0xff]  ;;  %v327_v63 = vmax.f32 %v131_v49, %v278_v53  ;;  %v133_v0 = vmax.f32 %v35_v60, %v84_v61  ;;  %v328_v4 = vmax.f32 %v132_v58, %v279_v59  ;;  %v183_v7 = vld [vmem:[%s1175_s2 + $0x98] sm:$0xff]  ;;  %v184_v12 = vld [vmem:[%s1175_s2 + $0xa0] sm:$0xff] }
  0x1c   :  { %v231_v1 = vld [vmem:[%s1176_s3 + $0x90] sm:$0xff]  ;;  %v134_v6 = vmax.f32 %v36_v2, %v85_v3  ;;  %v232_v8 = vld [vmem:[%s1176_s3 + $0x98] sm:$0xff]  ;;  %v233_v13 = vld [vmem:[%s1176_s3 + $0xa0] sm:$0xff]  ;;  %v135_v15 = vmax.f32 %v37_v9, %v86_v11 }
  0x1d   :  { %375 = vst [vmem:[%s1177_s4 + $0x78] sm:$0xff] %v326_v57  ;;  %v280_v5 = vmax.f32 %v182_v62, %v231_v1  ;;  %v281_v10 = vmax.f32 %v183_v7, %v232_v8  ;;  %v282_v16 = vmax.f32 %v184_v12, %v233_v13  ;;  %v38_v17 = vld [vmem:[%s1173_s0 + $0xa8] sm:$0xff]  ;;  %v39_v23 = vld [vmem:[%s1173_s0 + $0xb0] sm:$0xff]  ;;  %v40_v30 = vld [vmem:[%s1173_s0 + $0xb8] sm:$0xff] }
  0x1e   :  { %376 = vst [vmem:[%s1177_s4 + $0x80] sm:$0xff] %v327_v63  ;;  %v87_v18 = vld [vmem:[%s1174_s1 + $0xa8] sm:$0xff]  ;;  %v88_v24 = vld [vmem:[%s1174_s1 + $0xb0] sm:$0xff]  ;;  %v89_v32 = vld [vmem:[%s1174_s1 + $0xb8] sm:$0xff] }
  0x1f   :  { %377 = vst [vmem:[%s1177_s4 + $0x88] sm:$0xff] %v328_v4  ;;  %v329_v14 = vmax.f32 %v133_v0, %v280_v5  ;;  %v185_v19 = vld [vmem:[%s1175_s2 + $0xa8] sm:$0xff]  ;;  %v330_v20 = vmax.f32 %v134_v6, %v281_v10  ;;  %v136_v21 = vmax.f32 %v38_v17, %v87_v18  ;;  %v331_v25 = vmax.f32 %v135_v15, %v282_v16  ;;  %v186_v28 = vld [vmem:[%s1175_s2 + $0xb0] sm:$0xff]  ;;  %v187_v33 = vld [vmem:[%s1175_s2 + $0xb8] sm:$0xff] }
  0x20   :  { %v234_v22 = vld [vmem:[%s1176_s3 + $0xa8] sm:$0xff]  ;;  %v137_v27 = vmax.f32 %v39_v23, %v88_v24  ;;  %v235_v29 = vld [vmem:[%s1176_s3 + $0xb0] sm:$0xff]  ;;  %v236_v34 = vld [vmem:[%s1176_s3 + $0xb8] sm:$0xff]  ;;  %v138_v36 = vmax.f32 %v40_v30, %v89_v32 }
  0x21   :  { %378 = vst [vmem:[%s1177_s4 + $0x90] sm:$0xff] %v329_v14  ;;  %v283_v26 = vmax.f32 %v185_v19, %v234_v22  ;;  %v284_v31 = vmax.f32 %v186_v28, %v235_v29  ;;  %v285_v37 = vmax.f32 %v187_v33, %v236_v34  ;;  %v41_v38 = vld [vmem:[%s1173_s0 + $0xc0] sm:$0xff]  ;;  %v42_v44 = vld [vmem:[%s1173_s0 + $0xc8] sm:$0xff]  ;;  %v43_v51 = vld [vmem:[%s1173_s0 + $0xd0] sm:$0xff] }
  0x22   :  { %379 = vst [vmem:[%s1177_s4 + $0x98] sm:$0xff] %v330_v20  ;;  %v90_v39 = vld [vmem:[%s1174_s1 + $0xc0] sm:$0xff]  ;;  %v91_v45 = vld [vmem:[%s1174_s1 + $0xc8] sm:$0xff]  ;;  %v92_v53 = vld [vmem:[%s1174_s1 + $0xd0] sm:$0xff] }
  0x23   :  { %380 = vst [vmem:[%s1177_s4 + $0xa0] sm:$0xff] %v331_v25  ;;  %v332_v35 = vmax.f32 %v136_v21, %v283_v26  ;;  %v188_v40 = vld [vmem:[%s1175_s2 + $0xc0] sm:$0xff]  ;;  %v333_v41 = vmax.f32 %v137_v27, %v284_v31  ;;  %v139_v42 = vmax.f32 %v41_v38, %v90_v39  ;;  %v334_v46 = vmax.f32 %v138_v36, %v285_v37  ;;  %v189_v49 = vld [vmem:[%s1175_s2 + $0xc8] sm:$0xff]  ;;  %v190_v54 = vld [vmem:[%s1175_s2 + $0xd0] sm:$0xff] }
  0x24   :  { %v237_v43 = vld [vmem:[%s1176_s3 + $0xc0] sm:$0xff]  ;;  %v140_v48 = vmax.f32 %v42_v44, %v91_v45  ;;  %v238_v50 = vld [vmem:[%s1176_s3 + $0xc8] sm:$0xff]  ;;  %v239_v55 = vld [vmem:[%s1176_s3 + $0xd0] sm:$0xff]  ;;  %v141_v57 = vmax.f32 %v43_v51, %v92_v53 }
  0x25   :  { %381 = vst [vmem:[%s1177_s4 + $0xa8] sm:$0xff] %v332_v35  ;;  %v286_v47 = vmax.f32 %v188_v40, %v237_v43  ;;  %v287_v52 = vmax.f32 %v189_v49, %v238_v50  ;;  %v288_v58 = vmax.f32 %v190_v54, %v239_v55  ;;  %v44_v59 = vld [vmem:[%s1173_s0 + $0xd8] sm:$0xff]  ;;  %v45_v1 = vld [vmem:[%s1173_s0 + $0xe0] sm:$0xff]  ;;  %v46_v8 = vld [vmem:[%s1173_s0 + $0xe8] sm:$0xff] }
  0x26   :  { %382 = vst [vmem:[%s1177_s4 + $0xb0] sm:$0xff] %v333_v41  ;;  %v93_v60 = vld [vmem:[%s1174_s1 + $0xd8] sm:$0xff]  ;;  %v94_v2 = vld [vmem:[%s1174_s1 + $0xe0] sm:$0xff]  ;;  %v95_v10 = vld [vmem:[%s1174_s1 + $0xe8] sm:$0xff] }
  0x27   :  { %383 = vst [vmem:[%s1177_s4 + $0xb8] sm:$0xff] %v334_v46  ;;  %v335_v56 = vmax.f32 %v139_v42, %v286_v47  ;;  %v191_v61 = vld [vmem:[%s1175_s2 + $0xd8] sm:$0xff]  ;;  %v336_v62 = vmax.f32 %v140_v48, %v287_v52  ;;  %v142_v63 = vmax.f32 %v44_v59, %v93_v60  ;;  %v337_v3 = vmax.f32 %v141_v57, %v288_v58  ;;  %v192_v6 = vld [vmem:[%s1175_s2 + $0xe0] sm:$0xff]  ;;  %v193_v11 = vld [vmem:[%s1175_s2 + $0xe8] sm:$0xff] }
  0x28   :  { %v240_v0 = vld [vmem:[%s1176_s3 + $0xd8] sm:$0xff]  ;;  %v143_v5 = vmax.f32 %v45_v1, %v94_v2  ;;  %v241_v7 = vld [vmem:[%s1176_s3 + $0xe0] sm:$0xff]  ;;  %v242_v12 = vld [vmem:[%s1176_s3 + $0xe8] sm:$0xff]  ;;  %v144_v14 = vmax.f32 %v46_v8, %v95_v10 }
  0x29   :  { %384 = vst [vmem:[%s1177_s4 + $0xc0] sm:$0xff] %v335_v56  ;;  %v289_v4 = vmax.f32 %v191_v61, %v240_v0  ;;  %v290_v9 = vmax.f32 %v192_v6, %v241_v7  ;;  %v291_v15 = vmax.f32 %v193_v11, %v242_v12  ;;  %v47_v16 = vld [vmem:[%s1173_s0 + $0xf0] sm:$0xff]  ;;  %v48_v22 = vld [vmem:[%s1173_s0 + $0xf8] sm:$0xff]  ;;  %v49_v29 = vld [vmem:[%s1173_s0 + $0x100] sm:$0xff] }
  0x2a   :  { %385 = vst [vmem:[%s1177_s4 + $0xc8] sm:$0xff] %v336_v62  ;;  %v96_v17 = vld [vmem:[%s1174_s1 + $0xf0] sm:$0xff]  ;;  %v97_v23 = vld [vmem:[%s1174_s1 + $0xf8] sm:$0xff]  ;;  %v98_v31 = vld [vmem:[%s1174_s1 + $0x100] sm:$0xff] }
  0x2b   :  { %386 = vst [vmem:[%s1177_s4 + $0xd0] sm:$0xff] %v337_v3  ;;  %v338_v13 = vmax.f32 %v142_v63, %v289_v4  ;;  %v194_v18 = vld [vmem:[%s1175_s2 + $0xf0] sm:$0xff]  ;;  %v339_v19 = vmax.f32 %v143_v5, %v290_v9  ;;  %v145_v20 = vmax.f32 %v47_v16, %v96_v17  ;;  %v340_v24 = vmax.f32 %v144_v14, %v291_v15  ;;  %v195_v27 = vld [vmem:[%s1175_s2 + $0xf8] sm:$0xff]  ;;  %v196_v32 = vld [vmem:[%s1175_s2 + $0x100] sm:$0xff] }
  0x2c   :  { %v243_v21 = vld [vmem:[%s1176_s3 + $0xf0] sm:$0xff]  ;;  %v146_v26 = vmax.f32 %v48_v22, %v97_v23  ;;  %v244_v28 = vld [vmem:[%s1176_s3 + $0xf8] sm:$0xff]  ;;  %v245_v33 = vld [vmem:[%s1176_s3 + $0x100] sm:$0xff]  ;;  %v147_v35 = vmax.f32 %v49_v29, %v98_v31 }
  0x2d   :  { %387 = vst [vmem:[%s1177_s4 + $0xd8] sm:$0xff] %v338_v13  ;;  %v292_v25 = vmax.f32 %v194_v18, %v243_v21  ;;  %v293_v30 = vmax.f32 %v195_v27, %v244_v28  ;;  %v294_v36 = vmax.f32 %v196_v32, %v245_v33  ;;  %v50_v37 = vld [vmem:[%s1173_s0 + $0x108] sm:$0xff]  ;;  %v51_v43 = vld [vmem:[%s1173_s0 + $0x110] sm:$0xff]  ;;  %v52_v50 = vld [vmem:[%s1173_s0 + $0x118] sm:$0xff] }
  0x2e   :  { %388 = vst [vmem:[%s1177_s4 + $0xe0] sm:$0xff] %v339_v19  ;;  %v99_v38 = vld [vmem:[%s1174_s1 + $0x108] sm:$0xff]  ;;  %v100_v44 = vld [vmem:[%s1174_s1 + $0x110] sm:$0xff]  ;;  %v101_v52 = vld [vmem:[%s1174_s1 + $0x118] sm:$0xff] }
  0x2f   :  { %389 = vst [vmem:[%s1177_s4 + $0xe8] sm:$0xff] %v340_v24  ;;  %v341_v34 = vmax.f32 %v145_v20, %v292_v25  ;;  %v197_v39 = vld [vmem:[%s1175_s2 + $0x108] sm:$0xff]  ;;  %v342_v40 = vmax.f32 %v146_v26, %v293_v30  ;;  %v148_v41 = vmax.f32 %v50_v37, %v99_v38  ;;  %v343_v45 = vmax.f32 %v147_v35, %v294_v36  ;;  %v198_v48 = vld [vmem:[%s1175_s2 + $0x110] sm:$0xff]  ;;  %v199_v53 = vld [vmem:[%s1175_s2 + $0x118] sm:$0xff] }
  0x30   :  { %v246_v42 = vld [vmem:[%s1176_s3 + $0x108] sm:$0xff]  ;;  %v149_v47 = vmax.f32 %v51_v43, %v100_v44  ;;  %v247_v49 = vld [vmem:[%s1176_s3 + $0x110] sm:$0xff]  ;;  %v248_v54 = vld [vmem:[%s1176_s3 + $0x118] sm:$0xff]  ;;  %v150_v56 = vmax.f32 %v52_v50, %v101_v52 }
  0x31   :  { %390 = vst [vmem:[%s1177_s4 + $0xf0] sm:$0xff] %v341_v34  ;;  %v295_v46 = vmax.f32 %v197_v39, %v246_v42  ;;  %v296_v51 = vmax.f32 %v198_v48, %v247_v49  ;;  %v297_v57 = vmax.f32 %v199_v53, %v248_v54  ;;  %v53_v58 = vld [vmem:[%s1173_s0 + $0x120] sm:$0xff]  ;;  %v54_v0 = vld [vmem:[%s1173_s0 + $0x128] sm:$0xff]  ;;  %v55_v7 = vld [vmem:[%s1173_s0 + $0x130] sm:$0xff] }
  0x32   :  { %391 = vst [vmem:[%s1177_s4 + $0xf8] sm:$0xff] %v342_v40  ;;  %v102_v59 = vld [vmem:[%s1174_s1 + $0x120] sm:$0xff]  ;;  %v103_v1 = vld [vmem:[%s1174_s1 + $0x128] sm:$0xff]  ;;  %v104_v9 = vld [vmem:[%s1174_s1 + $0x130] sm:$0xff] }
  0x33   :  { %392 = vst [vmem:[%s1177_s4 + $0x100] sm:$0xff] %v343_v45  ;;  %v344_v55 = vmax.f32 %v148_v41, %v295_v46  ;;  %v200_v60 = vld [vmem:[%s1175_s2 + $0x120] sm:$0xff]  ;;  %v345_v61 = vmax.f32 %v149_v47, %v296_v51  ;;  %v151_v62 = vmax.f32 %v53_v58, %v102_v59  ;;  %v346_v2 = vmax.f32 %v150_v56, %v297_v57  ;;  %v201_v5 = vld [vmem:[%s1175_s2 + $0x128] sm:$0xff]  ;;  %v202_v10 = vld [vmem:[%s1175_s2 + $0x130] sm:$0xff] }
  0x34   :  { %v249_v63 = vld [vmem:[%s1176_s3 + $0x120] sm:$0xff]  ;;  %v152_v4 = vmax.f32 %v54_v0, %v103_v1  ;;  %v250_v6 = vld [vmem:[%s1176_s3 + $0x128] sm:$0xff]  ;;  %v251_v11 = vld [vmem:[%s1176_s3 + $0x130] sm:$0xff]  ;;  %v153_v13 = vmax.f32 %v55_v7, %v104_v9 }
  0x35   :  { %393 = vst [vmem:[%s1177_s4 + $0x108] sm:$0xff] %v344_v55  ;;  %v298_v3 = vmax.f32 %v200_v60, %v249_v63  ;;  %v299_v8 = vmax.f32 %v201_v5, %v250_v6  ;;  %v300_v14 = vmax.f32 %v202_v10, %v251_v11  ;;  %v56_v15 = vld [vmem:[%s1173_s0 + $0x138] sm:$0xff]  ;;  %v57_v21 = vld [vmem:[%s1173_s0 + $0x140] sm:$0xff]  ;;  %v58_v28 = vld [vmem:[%s1173_s0 + $0x148] sm:$0xff] }
  0x36   :  { %394 = vst [vmem:[%s1177_s4 + $0x110] sm:$0xff] %v345_v61  ;;  %v105_v16 = vld [vmem:[%s1174_s1 + $0x138] sm:$0xff]  ;;  %v106_v22 = vld [vmem:[%s1174_s1 + $0x140] sm:$0xff]  ;;  %v107_v30 = vld [vmem:[%s1174_s1 + $0x148] sm:$0xff] }
  0x37   :  { %395 = vst [vmem:[%s1177_s4 + $0x118] sm:$0xff] %v346_v2  ;;  %v347_v12 = vmax.f32 %v151_v62, %v298_v3  ;;  %v203_v17 = vld [vmem:[%s1175_s2 + $0x138] sm:$0xff]  ;;  %v348_v18 = vmax.f32 %v152_v4, %v299_v8  ;;  %v154_v19 = vmax.f32 %v56_v15, %v105_v16  ;;  %v349_v23 = vmax.f32 %v153_v13, %v300_v14  ;;  %v204_v26 = vld [vmem:[%s1175_s2 + $0x140] sm:$0xff]  ;;  %v205_v31 = vld [vmem:[%s1175_s2 + $0x148] sm:$0xff] }
  0x38   :  { %v252_v20 = vld [vmem:[%s1176_s3 + $0x138] sm:$0xff]  ;;  %v155_v25 = vmax.f32 %v57_v21, %v106_v22  ;;  %v253_v27 = vld [vmem:[%s1176_s3 + $0x140] sm:$0xff]  ;;  %v254_v32 = vld [vmem:[%s1176_s3 + $0x148] sm:$0xff]  ;;  %v156_v34 = vmax.f32 %v58_v28, %v107_v30 }
  0x39   :  { %396 = vst [vmem:[%s1177_s4 + $0x120] sm:$0xff] %v347_v12  ;;  %v301_v24 = vmax.f32 %v203_v17, %v252_v20  ;;  %v302_v29 = vmax.f32 %v204_v26, %v253_v27  ;;  %v303_v35 = vmax.f32 %v205_v31, %v254_v32  ;;  %v59_v36 = vld [vmem:[%s1173_s0 + $0x150] sm:$0xff]  ;;  %v60_v42 = vld [vmem:[%s1173_s0 + $0x158] sm:$0xff]  ;;  %v61_v49 = vld [vmem:[%s1173_s0 + $0x160] sm:$0xff] }
  0x3a   :  { %397 = vst [vmem:[%s1177_s4 + $0x128] sm:$0xff] %v348_v18  ;;  %v108_v37 = vld [vmem:[%s1174_s1 + $0x150] sm:$0xff]  ;;  %v109_v43 = vld [vmem:[%s1174_s1 + $0x158] sm:$0xff]  ;;  %v110_v51 = vld [vmem:[%s1174_s1 + $0x160] sm:$0xff] }
  0x3b   :  { %398 = vst [vmem:[%s1177_s4 + $0x130] sm:$0xff] %v349_v23  ;;  %v350_v33 = vmax.f32 %v154_v19, %v301_v24  ;;  %v206_v38 = vld [vmem:[%s1175_s2 + $0x150] sm:$0xff]  ;;  %v351_v39 = vmax.f32 %v155_v25, %v302_v29  ;;  %v157_v40 = vmax.f32 %v59_v36, %v108_v37  ;;  %v352_v44 = vmax.f32 %v156_v34, %v303_v35  ;;  %v207_v47 = vld [vmem:[%s1175_s2 + $0x158] sm:$0xff]  ;;  %v208_v52 = vld [vmem:[%s1175_s2 + $0x160] sm:$0xff] }
  0x3c   :  { %v255_v41 = vld [vmem:[%s1176_s3 + $0x150] sm:$0xff]  ;;  %v158_v46 = vmax.f32 %v60_v42, %v109_v43  ;;  %v256_v48 = vld [vmem:[%s1176_s3 + $0x158] sm:$0xff]  ;;  %v257_v53 = vld [vmem:[%s1176_s3 + $0x160] sm:$0xff]  ;;  %v159_v55 = vmax.f32 %v61_v49, %v110_v51 }
  0x3d   :  { %399 = vst [vmem:[%s1177_s4 + $0x138] sm:$0xff] %v350_v33  ;;  %v304_v45 = vmax.f32 %v206_v38, %v255_v41  ;;  %v305_v50 = vmax.f32 %v207_v47, %v256_v48  ;;  %v306_v56 = vmax.f32 %v208_v52, %v257_v53  ;;  %v62_v57 = vld [vmem:[%s1173_s0 + $0x168] sm:$0xff]  ;;  %v63_v63 = vld [vmem:[%s1173_s0 + $0x170] sm:$0xff]  ;;  %v64_v6 = vld [vmem:[%s1173_s0 + $0x178] sm:$0xff] }
  0x3e   :  { %400 = vst [vmem:[%s1177_s4 + $0x140] sm:$0xff] %v351_v39  ;;  %v111_v58 = vld [vmem:[%s1174_s1 + $0x168] sm:$0xff]  ;;  %v112_v0 = vld [vmem:[%s1174_s1 + $0x170] sm:$0xff]  ;;  %v113_v8 = vld [vmem:[%s1174_s1 + $0x178] sm:$0xff] }
  0x3f   :  { %401 = vst [vmem:[%s1177_s4 + $0x148] sm:$0xff] %v352_v44  ;;  %v353_v54 = vmax.f32 %v157_v40, %v304_v45  ;;  %v209_v59 = vld [vmem:[%s1175_s2 + $0x168] sm:$0xff]  ;;  %v354_v60 = vmax.f32 %v158_v46, %v305_v50  ;;  %v160_v61 = vmax.f32 %v62_v57, %v111_v58  ;;  %v355_v1 = vmax.f32 %v159_v55, %v306_v56  ;;  %v210_v4 = vld [vmem:[%s1175_s2 + $0x170] sm:$0xff]  ;;  %v211_v9 = vld [vmem:[%s1175_s2 + $0x178] sm:$0xff] }
  0x40   :  { %v258_v62 = vld [vmem:[%s1176_s3 + $0x168] sm:$0xff]  ;;  %v161_v3 = vmax.f32 %v63_v63, %v112_v0  ;;  %v259_v5 = vld [vmem:[%s1176_s3 + $0x170] sm:$0xff]  ;;  %v260_v10 = vld [vmem:[%s1176_s3 + $0x178] sm:$0xff]  ;;  %v162_v12 = vmax.f32 %v64_v6, %v113_v8 }
  0x41   :  { %402 = vst [vmem:[%s1177_s4 + $0x150] sm:$0xff] %v353_v54  ;;  %v307_v2 = vmax.f32 %v209_v59, %v258_v62  ;;  %v308_v7 = vmax.f32 %v210_v4, %v259_v5  ;;  %v309_v13 = vmax.f32 %v211_v9, %v260_v10  ;;  %v65_v14 = vld [vmem:[%s1173_s0 + $0x180] sm:$0xff] }
  0x42   :  { %403 = vst [vmem:[%s1177_s4 + $0x158] sm:$0xff] %v354_v60  ;;  %v114_v15 = vld [vmem:[%s1174_s1 + $0x180] sm:$0xff] }
  0x43   :  { %404 = vst [vmem:[%s1177_s4 + $0x160] sm:$0xff] %v355_v1  ;;  %v356_v11 = vmax.f32 %v160_v61, %v307_v2  ;;  %v212_v16 = vld [vmem:[%s1175_s2 + $0x180] sm:$0xff]  ;;  %v357_v17 = vmax.f32 %v161_v3, %v308_v7  ;;  %v163_v18 = vmax.f32 %v65_v14, %v114_v15  ;;  %v358_v20 = vmax.f32 %v162_v12, %v309_v13 }
  0x44   :  { %v261_v19 = vld [vmem:[%s1176_s3 + $0x180] sm:$0xff] }
  0x45   :  { %405 = vst [vmem:[%s1177_s4 + $0x168] sm:$0xff] %v356_v11  ;;  %v310_v21 = vmax.f32 %v212_v16, %v261_v19 }
  0x46   :  { %406 = vst [vmem:[%s1177_s4 + $0x170] sm:$0xff] %v357_v17 }
  0x47   :  { %407 = vst [vmem:[%s1177_s4 + $0x178] sm:$0xff] %v358_v20  ;;  %v359_v22 = vmax.f32 %v163_v18, %v310_v21 }
  0x49   :  { %408 = vst [vmem:[%s1177_s4 + $0x180] sm:$0xff] %v359_v22 }

// kernel: cnn_forward.5
= control target key start
LH: loop header
LB: loop body
LE: loop exit
PB: predicated region body
PF: predicated region fallthrough
CT: control target
= control target key end

     0   :  { %s1123_s12 = smov 0   ;;  %s1337_s0 = inlined_call_operand.vmem [shape: bf16[2048,128], index: 0, kind: input, shape index: {}]   ;;  %s1338_s1 = inlined_call_operand.vmem [shape: bf16[128,128], index: 1, kind: input, shape index: {}]   ;;  %s1339_s2 = inlined_call_operand.vmem [shape: f32[1,128], index: 2, kind: input, shape index: {}]   ;;  %s1340_s3 = inlined_call_operand.vmem [shape: f32[2048,128], index: 3, kind: output, shape index: {}]  }
   0x1 LB: > { %s851_s13 = sadd.s32 4294967295, %s1101_s12   ;;  %p855_p0 = scmp.ge.s32.totalorder %s1101_s12, 1  ;;  %s1101_s12 = sphi %s1123_s12, %s13_s12  }
   0x2   : > { %p138_p1 = scmp.lt.s32.totalorder %s1101_s12, 5 }
   0x4   : > { %p139_p2 = pnand %p855_p0, %p138_p1 }
   0x5   : > { %s856_s22 = sshll.u32 (!%p139_p2), %s851_s13, 6 }
   0x6   : > { %142 = sbr.rel (%p139_p2) target bundleno = 302 (0x12e), region = 32  ;;  %p163_p3 = scmp.lt.s32.totalorder (!%p139_p2), %s856_s22, 255 }
   0xb   : > { %v1061_v0 = vld [vmem:[%s1338_s1 + $0x38] sm:$0xff]  ;;  %v1060_v1 = vld [vmem:[%s1338_s1 + $0x30] sm:$0xff]  ;;  %v1059_v2 = vld [vmem:[%s1338_s1 + $0x28] sm:$0xff]  ;;  %s1342_s22 = smov (!%p163_p3, %s856_s22), 255 }
   0xc   : > { %498 = vmatpush.bf16.msra.mxu0 %v1061_v0  ;;  %1062 = vmatpush.bf16.msra.mxu1 %v1061_v0  ;;  %v1058_v3 = vld [vmem:[%s1338_s1 + $0x20] sm:$0xff]  ;;  %v1057_v4 = vld [vmem:[%s1338_s1 + $0x18] sm:$0xff]  ;;  %v1056_v5 = vld [vmem:[%s1338_s1 + $0x10] sm:$0xff]  ;;  %s857_s29 = sshll.u32 %s1342_s22, 2  ;;  %s859_s10 = sshll.u32 %s1342_s22, 3 }
   0xd   : > { %1063 = vmatpush.bf16.msra.mxu2 %v1061_v0  ;;  %1064 = vmatpush.bf16.msra.mxu3 %v1061_v0  ;;  %v1055_v6 = vld [vmem:[%s1338_s1 + $0x8] sm:$0xff]  ;;  %v1054_v7 = vld [vmem:[%s1338_s1] sm:$0xff]  ;;  %s1161_s7 = scalar_lea.vmem %s1337_s0, %s857_s29  ;;  %s1206_s14 = scalar_lea.vmem %s1340_s3, %s859_s10 }
   0xe   : > { %v1022_v8 = vld [vmem:[%s1161_s7] sm:$0xff]  ;;  %v1023_v12 = vld [vmem:[%s1161_s7 + $0x8] sm:$0xff]  ;;  %v1024_v16 = vld [vmem:[%s1161_s7 + $0x10] sm:$0xff] }
   0xf   : > { %v1030_v9 = vld [vmem:[%s1161_s7 + $0x40] sm:$0xff]  ;;  %v1031_v13 = vld [vmem:[%s1161_s7 + $0x48] sm:$0xff]  ;;  %v1032_v17 = vld [vmem:[%s1161_s7 + $0x50] sm:$0xff] }
  0x10   : > { %499 = vmatpush.bf16.msra.mxu0 %v1060_v1  ;;  %1065 = vmatpush.bf16.msra.mxu1 %v1060_v1  ;;  %v1038_v10 = vld [vmem:[%s1161_s7 + $0x80] sm:$0xff]  ;;  %v1039_v14 = vld [vmem:[%s1161_s7 + $0x88] sm:$0xff]  ;;  %v1040_v18 = vld [vmem:[%s1161_s7 + $0x90] sm:$0xff] }
  0x11   : > { %1066 = vmatpush.bf16.msra.mxu2 %v1060_v1  ;;  %1067 = vmatpush.bf16.msra.mxu3 %v1060_v1  ;;  %v1046_v11 = vld [vmem:[%s1161_s7 + $0xc0] sm:$0xff]  ;;  %v1047_v15 = vld [vmem:[%s1161_s7 + $0xc8] sm:$0xff]  ;;  %v1048_v19 = vld [vmem:[%s1161_s7 + $0xd0] sm:$0xff] }
  0x12   : > { %v1025_v20 = vld [vmem:[%s1161_s7 + $0x18] sm:$0xff]  ;;  %v1026_v24 = vld [vmem:[%s1161_s7 + $0x20] sm:$0xff]  ;;  %v1027_v28 = vld [vmem:[%s1161_s7 + $0x28] sm:$0xff] }
  0x13   : > { %v1033_v21 = vld [vmem:[%s1161_s7 + $0x58] sm:$0xff]  ;;  %v1034_v25 = vld [vmem:[%s1161_s7 + $0x60] sm:$0xff]  ;;  %v1035_v29 = vld [vmem:[%s1161_s7 + $0x68] sm:$0xff] }
  0x14   : > { %500 = vmatpush.bf16.msra.mxu0 %v1059_v2  ;;  %1068 = vmatpush.bf16.msra.mxu1 %v1059_v2  ;;  %v1041_v22 = vld [vmem:[%s1161_s7 + $0x98] sm:$0xff]  ;;  %v1042_v26 = vld [vmem:[%s1161_s7 + $0xa0] sm:$0xff]  ;;  %v1043_v30 = vld [vmem:[%s1161_s7 + $0xa8] sm:$0xff] }
  0x15   : > { %1069 = vmatpush.bf16.msra.mxu2 %v1059_v2  ;;  %1070 = vmatpush.bf16.msra.mxu3 %v1059_v2  ;;  %v1049_v23 = vld [vmem:[%s1161_s7 + $0xd8] sm:$0xff]  ;;  %v1050_v27 = vld [vmem:[%s1161_s7 + $0xe0] sm:$0xff]  ;;  %v1051_v31 = vld [vmem:[%s1161_s7 + $0xe8] sm:$0xff] }
  0x16   : > { %v1028_v32 = vld [vmem:[%s1161_s7 + $0x30] sm:$0xff]  ;;  %v1029_v36 = vld [vmem:[%s1161_s7 + $0x38] sm:$0xff]  ;;  %v1198_v40 = vld [vmem:[%s1339_s2] ss:$0 sm:$0xff] }
  0x17   : > { %v1036_v33 = vld [vmem:[%s1161_s7 + $0x70] sm:$0xff]  ;;  %v1037_v37 = vld [vmem:[%s1161_s7 + $0x78] sm:$0xff] }
  0x18   : > { %501 = vmatpush.bf16.msra.mxu0 %v1058_v3  ;;  %1071 = vmatpush.bf16.msra.mxu1 %v1058_v3  ;;  %v1044_v34 = vld [vmem:[%s1161_s7 + $0xb0] sm:$0xff]  ;;  %v1045_v38 = vld [vmem:[%s1161_s7 + $0xb8] sm:$0xff] }
  0x19   : > { %1072 = vmatpush.bf16.msra.mxu2 %v1058_v3  ;;  %1073 = vmatpush.bf16.msra.mxu3 %v1058_v3  ;;  %v1052_v35 = vld [vmem:[%s1161_s7 + $0xf0] sm:$0xff]  ;;  %v1053_v39 = vld [vmem:[%s1161_s7 + $0xf8] sm:$0xff] }
  0x1c   : > { %502 = vmatpush.bf16.msra.mxu0 %v1057_v4  ;;  %1074 = vmatpush.bf16.msra.mxu1 %v1057_v4 }
  0x1d   : > { %1075 = vmatpush.bf16.msra.mxu2 %v1057_v4  ;;  %1076 = vmatpush.bf16.msra.mxu3 %v1057_v4 }
  0x20   : > { %503 = vmatpush.bf16.msra.mxu0 %v1056_v5  ;;  %1077 = vmatpush.bf16.msra.mxu1 %v1056_v5 }
  0x21   : > { %1078 = vmatpush.bf16.msra.mxu2 %v1056_v5  ;;  %1079 = vmatpush.bf16.msra.mxu3 %v1056_v5 }
  0x24   : > { %504 = vmatpush.bf16.msra.mxu0 %v1055_v6  ;;  %1080 = vmatpush.bf16.msra.mxu1 %v1055_v6 }
  0x25   : > { %1081 = vmatpush.bf16.msra.mxu2 %v1055_v6  ;;  %1082 = vmatpush.bf16.msra.mxu3 %v1055_v6 }
  0x28   : > { %505 = vmatpush.bf16.msra.mxu0 %v1054_v7  ;;  %1083 = vmatpush.bf16.msra.mxu1 %v1054_v7 }
  0x29   : > { %1084 = vmatpush.bf16.msra.mxu2 %v1054_v7  ;;  %1085 = vmatpush.bf16.msra.mxu3 %v1054_v7 }
  0x2b   : > { %506 = vmatmul.bf16.vlgmr.msra.gmra.mxu0 %v1022_v8  ;;  %546 = vmatmul.bf16.vlgmr.msra.gmra.mxu1 %v1030_v9 }
  0x2c   : > { %586 = vmatmul.bf16.vlgmr.msra.gmra.mxu2 %v1038_v10  ;;  %626 = vmatmul.bf16.vlgmr.msra.gmra.mxu3 %v1046_v11 }
  0x3b   : > { %511 = vmatmul.bf16.gmra.mxu0 %v1023_v12  ;;  %551 = vmatmul.bf16.gmra.mxu1 %v1031_v13 }
  0x3c   : > { %591 = vmatmul.bf16.gmra.mxu2 %v1039_v14  ;;  %631 = vmatmul.bf16.gmra.mxu3 %v1047_v15 }
  0x4b   : > { %516 = vmatmul.bf16.gmra.mxu0 %v1024_v16  ;;  %556 = vmatmul.bf16.gmra.mxu1 %v1032_v17 }
  0x4c   : > { %596 = vmatmul.bf16.gmra.mxu2 %v1040_v18  ;;  %636 = vmatmul.bf16.gmra.mxu3 %v1048_v19 }
  0x5b   : > { %521 = vmatmul.bf16.gmra.mxu0 %v1025_v20  ;;  %561 = vmatmul.bf16.gmra.mxu1 %v1033_v21 }
  0x5c   : > { %601 = vmatmul.bf16.gmra.mxu2 %v1041_v22  ;;  %641 = vmatmul.bf16.gmra.mxu3 %v1049_v23 }
  0x6b   : > { %526 = vmatmul.bf16.gmra.mxu0 %v1026_v24  ;;  %566 = vmatmul.bf16.gmra.mxu1 %v1034_v25 }
  0x6c   : > { %606 = vmatmul.bf16.gmra.mxu2 %v1042_v26  ;;  %646 = vmatmul.bf16.gmra.mxu3 %v1050_v27 }
  0x7b   : > { %531 = vmatmul.bf16.gmra.mxu0 %v1027_v28  ;;  %571 = vmatmul.bf16.gmra.mxu1 %v1035_v29 }
  0x7c   : > { %611 = vmatmul.bf16.gmra.mxu2 %v1043_v30  ;;  %651 = vmatmul.bf16.gmra.mxu3 %v1051_v31 }
  0x8b   : > { %536 = vmatmul.bf16.gmra.mxu0 %v1028_v32  ;;  %576 = vmatmul.bf16.gmra.mxu1 %v1036_v33 }
  0x8c   : > { %616 = vmatmul.bf16.gmra.mxu2 %v1044_v34  ;;  %656 = vmatmul.bf16.gmra.mxu3 %v1052_v35 }
  0x9b   : > { %541 = vmatmul.bf16.gmra.mxu0 %v1029_v36  ;;  %581 = vmatmul.bf16.gmra.mxu1 %v1037_v37 }
  0x9c   : > { %621 = vmatmul.bf16.gmra.mxu2 %v1045_v38  ;;  %661 = vmatmul.bf16.gmra.mxu3 %v1053_v39 }
  0xa8   : > { %v507_v41 = vpop.f32.mrf.mxu0  ;;  %v547_v42 = vpop.f32.mrf.mxu1 }
  0xa9   : > { %v508_v43 = vadd.f32 %v1198_v40, %v507_v41  ;;  %v548_v44 = vadd.f32 %v1198_v40, %v547_v42 }
  0xab   : > { %v667_v45 = vmax.f32 %v508_v43, 0.0  ;;  %v683_v46 = vmax.f32 %v548_v44, 0.0 }
  0xad   : > { %731 = vst [vmem:[%s1206_s14] sm:$0xff] %v667_v45 }
  0xae   : > { %747 = vst [vmem:[%s1206_s14 + $0x80] sm:$0xff] %v683_v46 }
  0xaf   : > { %v587_v47 = vpop.f32.mrf.mxu2  ;;  %v627_v48 = vpop.f32.mrf.mxu3 }
  0xb0   : > { %v588_v49 = vadd.f32 %v1198_v40, %v587_v47  ;;  %v628_v50 = vadd.f32 %v1198_v40, %v627_v48  ;;  %v509_v51 = vpop.f32.mrf.mxu0  ;;  %v549_v52 = vpop.f32.mrf.mxu1 }
  0xb1   : > { %v510_v53 = vadd.f32 %v1198_v40, %v509_v51  ;;  %v550_v54 = vadd.f32 %v1198_v40, %v549_v52 }
  0xb2   : > { %v699_v55 = vmax.f32 %v588_v49, 0.0  ;;  %v715_v56 = vmax.f32 %v628_v50, 0.0 }
  0xb3   : > { %v668_v57 = vmax.f32 %v510_v53, 0.0  ;;  %v684_v58 = vmax.f32 %v550_v54, 0.0 }
  0xb4   : > { %763 = vst [vmem:[%s1206_s14 + $0x100] sm:$0xff] %v699_v55 }
  0xb5   : > { %779 = vst [vmem:[%s1206_s14 + $0x180] sm:$0xff] %v715_v56 }
  0xb6   : > { %732 = vst [vmem:[%s1206_s14 + $0x8] sm:$0xff] %v668_v57 }
  0xb7   : > { %748 = vst [vmem:[%s1206_s14 + $0x88] sm:$0xff] %v684_v58  ;;  %v589_v59 = vpop.f32.mrf.mxu2  ;;  %v629_v60 = vpop.f32.mrf.mxu3 }
  0xb8   : > { %v590_v61 = vadd.f32 %v1198_v40, %v589_v59  ;;  %v630_v62 = vadd.f32 %v1198_v40, %v629_v60  ;;  %v512_v63 = vpop.f32.mrf.mxu0  ;;  %v552_v0 = vpop.f32.mrf.mxu1 }
  0xb9   : > { %v513_v1 = vadd.f32 %v1198_v40, %v512_v63  ;;  %v553_v2 = vadd.f32 %v1198_v40, %v552_v0 }
  0xba   : > { %v700_v3 = vmax.f32 %v590_v61, 0.0  ;;  %v716_v4 = vmax.f32 %v630_v62, 0.0 }
  0xbb   : > { %v669_v5 = vmax.f32 %v513_v1, 0.0  ;;  %v685_v6 = vmax.f32 %v553_v2, 0.0 }
  0xbc   : > { %764 = vst [vmem:[%s1206_s14 + $0x108] sm:$0xff] %v700_v3 }
  0xbd   : > { %780 = vst [vmem:[%s1206_s14 + $0x188] sm:$0xff] %v716_v4 }
  0xbe   : > { %733 = vst [vmem:[%s1206_s14 + $0x10] sm:$0xff] %v669_v5 }
  0xbf   : > { %749 = vst [vmem:[%s1206_s14 + $0x90] sm:$0xff] %v685_v6  ;;  %v592_v7 = vpop.f32.mrf.mxu2  ;;  %v632_v8 = vpop.f32.mrf.mxu3 }
  0xc0   : > { %v593_v9 = vadd.f32 %v1198_v40, %v592_v7  ;;  %v633_v10 = vadd.f32 %v1198_v40, %v632_v8  ;;  %v514_v11 = vpop.f32.mrf.mxu0  ;;  %v554_v12 = vpop.f32.mrf.mxu1 }
  0xc1   : > { %v515_v13 = vadd.f32 %v1198_v40, %v514_v11  ;;  %v555_v14 = vadd.f32 %v1198_v40, %v554_v12 }
  0xc2   : > { %v701_v15 = vmax.f32 %v593_v9, 0.0  ;;  %v717_v16 = vmax.f32 %v633_v10, 0.0 }
  0xc3   : > { %v670_v17 = vmax.f32 %v515_v13, 0.0  ;;  %v686_v18 = vmax.f32 %v555_v14, 0.0 }
  0xc4   : > { %765 = vst [vmem:[%s1206_s14 + $0x110] sm:$0xff] %v701_v15 }
  0xc5   : > { %781 = vst [vmem:[%s1206_s14 + $0x190] sm:$0xff] %v717_v16 }
  0xc6   : > { %734 = vst [vmem:[%s1206_s14 + $0x18] sm:$0xff] %v670_v17 }
  0xc7   : > { %750 = vst [vmem:[%s1206_s14 + $0x98] sm:$0xff] %v686_v18  ;;  %v594_v19 = vpop.f32.mrf.mxu2  ;;  %v634_v20 = vpop.f32.mrf.mxu3 }
  0xc8   : > { %v595_v21 = vadd.f32 %v1198_v40, %v594_v19  ;;  %v635_v22 = vadd.f32 %v1198_v40, %v634_v20  ;;  %v517_v23 = vpop.f32.mrf.mxu0  ;;  %v557_v24 = vpop.f32.mrf.mxu1 }
  0xc9   : > { %v518_v25 = vadd.f32 %v1198_v40, %v517_v23  ;;  %v558_v26 = vadd.f32 %v1198_v40, %v557_v24 }
  0xca   : > { %v702_v27 = vmax.f32 %v595_v21, 0.0  ;;  %v718_v28 = vmax.f32 %v635_v22, 0.0 }
  0xcb   : > { %v671_v29 = vmax.f32 %v518_v25, 0.0  ;;  %v687_v30 = vmax.f32 %v558_v26, 0.0 }
  0xcc   : > { %766 = vst [vmem:[%s1206_s14 + $0x118] sm:$0xff] %v702_v27 }
  0xcd   : > { %782 = vst [vmem:[%s1206_s14 + $0x198] sm:$0xff] %v718_v28 }
  0xce   : > { %735 = vst [vmem:[%s1206_s14 + $0x20] sm:$0xff] %v671_v29 }
  0xcf   : > { %751 = vst [vmem:[%s1206_s14 + $0xa0] sm:$0xff] %v687_v30  ;;  %v597_v31 = vpop.f32.mrf.mxu2  ;;  %v637_v32 = vpop.f32.mrf.mxu3 }
  0xd0   : > { %v598_v33 = vadd.f32 %v1198_v40, %v597_v31  ;;  %v638_v34 = vadd.f32 %v1198_v40, %v637_v32  ;;  %v519_v35 = vpop.f32.mrf.mxu0  ;;  %v559_v36 = vpop.f32.mrf.mxu1 }
  0xd1   : > { %v520_v37 = vadd.f32 %v1198_v40, %v519_v35  ;;  %v560_v38 = vadd.f32 %v1198_v40, %v559_v36 }
  0xd2   : > { %v703_v39 = vmax.f32 %v598_v33, 0.0  ;;  %v719_v41 = vmax.f32 %v638_v34, 0.0 }
  0xd3   : > { %v672_v42 = vmax.f32 %v520_v37, 0.0  ;;  %v688_v43 = vmax.f32 %v560_v38, 0.0 }
  0xd4   : > { %767 = vst [vmem:[%s1206_s14 + $0x120] sm:$0xff] %v703_v39 }
  0xd5   : > { %783 = vst [vmem:[%s1206_s14 + $0x1a0] sm:$0xff] %v719_v41 }
  0xd6   : > { %736 = vst [vmem:[%s1206_s14 + $0x28] sm:$0xff] %v672_v42 }
  0xd7   : > { %752 = vst [vmem:[%s1206_s14 + $0xa8] sm:$0xff] %v688_v43  ;;  %v599_v44 = vpop.f32.mrf.mxu2  ;;  %v639_v45 = vpop.f32.mrf.mxu3 }
  0xd8   : > { %v600_v46 = vadd.f32 %v1198_v40, %v599_v44  ;;  %v640_v47 = vadd.f32 %v1198_v40, %v639_v45  ;;  %v522_v48 = vpop.f32.mrf.mxu0  ;;  %v562_v49 = vpop.f32.mrf.mxu1 }
  0xd9   : > { %v523_v50 = vadd.f32 %v1198_v40, %v522_v48  ;;  %v563_v51 = vadd.f32 %v1198_v40, %v562_v49 }
  0xda   : > { %v704_v52 = vmax.f32 %v600_v46, 0.0  ;;  %v720_v53 = vmax.f32 %v640_v47, 0.0 }
  0xdb   : > { %v673_v54 = vmax.f32 %v523_v50, 0.0  ;;  %v689_v55 = vmax.f32 %v563_v51, 0.0 }
  0xdc   : > { %768 = vst [vmem:[%s1206_s14 + $0x128] sm:$0xff] %v704_v52 }
  0xdd   : > { %784 = vst [vmem:[%s1206_s14 + $0x1a8] sm:$0xff] %v720_v53 }
  0xde   : > { %737 = vst [vmem:[%s1206_s14 + $0x30] sm:$0xff] %v673_v54 }
  0xdf   : > { %753 = vst [vmem:[%s1206_s14 + $0xb0] sm:$0xff] %v689_v55  ;;  %v602_v56 = vpop.f32.mrf.mxu2  ;;  %v642_v57 = vpop.f32.mrf.mxu3 }
  0xe0   : > { %v603_v58 = vadd.f32 %v1198_v40, %v602_v56  ;;  %v643_v59 = vadd.f32 %v1198_v40, %v642_v57  ;;  %v524_v60 = vpop.f32.mrf.mxu0  ;;  %v564_v61 = vpop.f32.mrf.mxu1 }
  0xe1   : > { %v525_v62 = vadd.f32 %v1198_v40, %v524_v60  ;;  %v565_v63 = vadd.f32 %v1198_v40, %v564_v61 }
  0xe2   : > { %v705_v0 = vmax.f32 %v603_v58, 0.0  ;;  %v721_v1 = vmax.f32 %v643_v59, 0.0 }
  0xe3   : > { %v674_v2 = vmax.f32 %v525_v62, 0.0  ;;  %v690_v3 = vmax.f32 %v565_v63, 0.0 }
  0xe4   : > { %769 = vst [vmem:[%s1206_s14 + $0x130] sm:$0xff] %v705_v0 }
  0xe5   : > { %785 = vst [vmem:[%s1206_s14 + $0x1b0] sm:$0xff] %v721_v1 }
  0xe6   : > { %738 = vst [vmem:[%s1206_s14 + $0x38] sm:$0xff] %v674_v2 }
  0xe7   : > { %754 = vst [vmem:[%s1206_s14 + $0xb8] sm:$0xff] %v690_v3  ;;  %v604_v4 = vpop.f32.mrf.mxu2  ;;  %v644_v5 = vpop.f32.mrf.mxu3 }
  0xe8   : > { %v605_v6 = vadd.f32 %v1198_v40, %v604_v4  ;;  %v645_v7 = vadd.f32 %v1198_v40, %v644_v5  ;;  %v527_v8 = vpop.f32.mrf.mxu0  ;;  %v567_v9 = vpop.f32.mrf.mxu1 }
  0xe9   : > { %v528_v10 = vadd.f32 %v1198_v40, %v527_v8  ;;  %v568_v11 = vadd.f32 %v1198_v40, %v567_v9 }
  0xea   : > { %v706_v12 = vmax.f32 %v605_v6, 0.0  ;;  %v722_v13 = vmax.f32 %v645_v7, 0.0 }
  0xeb   : > { %v675_v14 = vmax.f32 %v528_v10, 0.0  ;;  %v691_v15 = vmax.f32 %v568_v11, 0.0 }
  0xec   : > { %770 = vst [vmem:[%s1206_s14 + $0x138] sm:$0xff] %v706_v12 }
  0xed   : > { %786 = vst [vmem:[%s1206_s14 + $0x1b8] sm:$0xff] %v722_v13 }
  0xee   : > { %739 = vst [vmem:[%s1206_s14 + $0x40] sm:$0xff] %v675_v14 }
  0xef   : > { %755 = vst [vmem:[%s1206_s14 + $0xc0] sm:$0xff] %v691_v15  ;;  %v607_v16 = vpop.f32.mrf.mxu2  ;;  %v647_v17 = vpop.f32.mrf.mxu3 }
  0xf0   : > { %v608_v18 = vadd.f32 %v1198_v40, %v607_v16  ;;  %v648_v19 = vadd.f32 %v1198_v40, %v647_v17  ;;  %v529_v20 = vpop.f32.mrf.mxu0  ;;  %v569_v21 = vpop.f32.mrf.mxu1 }
  0xf1   : > { %v530_v22 = vadd.f32 %v1198_v40, %v529_v20  ;;  %v570_v23 = vadd.f32 %v1198_v40, %v569_v21 }
  0xf2   : > { %v707_v24 = vmax.f32 %v608_v18, 0.0  ;;  %v723_v25 = vmax.f32 %v648_v19, 0.0 }
  0xf3   : > { %v676_v26 = vmax.f32 %v530_v22, 0.0  ;;  %v692_v27 = vmax.f32 %v570_v23, 0.0 }
  0xf4   : > { %771 = vst [vmem:[%s1206_s14 + $0x140] sm:$0xff] %v707_v24 }
  0xf5   : > { %787 = vst [vmem:[%s1206_s14 + $0x1c0] sm:$0xff] %v723_v25 }
  0xf6   : > { %740 = vst [vmem:[%s1206_s14 + $0x48] sm:$0xff] %v676_v26 }
  0xf7   : > { %756 = vst [vmem:[%s1206_s14 + $0xc8] sm:$0xff] %v692_v27  ;;  %v609_v28 = vpop.f32.mrf.mxu2  ;;  %v649_v29 = vpop.f32.mrf.mxu3 }
  0xf8   : > { %v610_v30 = vadd.f32 %v1198_v40, %v609_v28  ;;  %v650_v31 = vadd.f32 %v1198_v40, %v649_v29  ;;  %v532_v32 = vpop.f32.mrf.mxu0  ;;  %v572_v33 = vpop.f32.mrf.mxu1 }
  0xf9   : > { %v533_v34 = vadd.f32 %v1198_v40, %v532_v32  ;;  %v573_v35 = vadd.f32 %v1198_v40, %v572_v33 }
  0xfa   : > { %v708_v36 = vmax.f32 %v610_v30, 0.0  ;;  %v724_v37 = vmax.f32 %v650_v31, 0.0 }
  0xfb   : > { %v677_v38 = vmax.f32 %v533_v34, 0.0  ;;  %v693_v39 = vmax.f32 %v573_v35, 0.0 }
  0xfc   : > { %772 = vst [vmem:[%s1206_s14 + $0x148] sm:$0xff] %v708_v36 }
  0xfd   : > { %788 = vst [vmem:[%s1206_s14 + $0x1c8] sm:$0xff] %v724_v37 }
  0xfe   : > { %741 = vst [vmem:[%s1206_s14 + $0x50] sm:$0xff] %v677_v38 }
  0xff   : > { %757 = vst [vmem:[%s1206_s14 + $0xd0] sm:$0xff] %v693_v39  ;;  %v612_v41 = vpop.f32.mrf.mxu2  ;;  %v652_v42 = vpop.f32.mrf.mxu3 }
 0x100   : > { %v613_v43 = vadd.f32 %v1198_v40, %v612_v41  ;;  %v653_v44 = vadd.f32 %v1198_v40, %v652_v42  ;;  %v534_v45 = vpop.f32.mrf.mxu0  ;;  %v574_v46 = vpop.f32.mrf.mxu1 }
 0x101   : > { %v535_v47 = vadd.f32 %v1198_v40, %v534_v45  ;;  %v575_v48 = vadd.f32 %v1198_v40, %v574_v46 }
 0x102   : > { %v709_v49 = vmax.f32 %v613_v43, 0.0  ;;  %v725_v50 = vmax.f32 %v653_v44, 0.0 }
 0x103   : > { %v678_v51 = vmax.f32 %v535_v47, 0.0  ;;  %v694_v52 = vmax.f32 %v575_v48, 0.0 }
 0x104   : > { %773 = vst [vmem:[%s1206_s14 + $0x150] sm:$0xff] %v709_v49 }
 0x105   : > { %789 = vst [vmem:[%s1206_s14 + $0x1d0] sm:$0xff] %v725_v50 }
 0x106   : > { %742 = vst [vmem:[%s1206_s14 + $0x58] sm:$0xff] %v678_v51 }
 0x107   : > { %758 = vst [vmem:[%s1206_s14 + $0xd8] sm:$0xff] %v694_v52  ;;  %v614_v53 = vpop.f32.mrf.mxu2  ;;  %v654_v54 = vpop.f32.mrf.mxu3 }
 0x108   : > { %v615_v55 = vadd.f32 %v1198_v40, %v614_v53  ;;  %v655_v56 = vadd.f32 %v1198_v40, %v654_v54  ;;  %v537_v57 = vpop.f32.mrf.mxu0  ;;  %v577_v58 = vpop.f32.mrf.mxu1 }
 0x109   : > { %v538_v59 = vadd.f32 %v1198_v40, %v537_v57  ;;  %v578_v60 = vadd.f32 %v1198_v40, %v577_v58 }
 0x10a   : > { %v710_v61 = vmax.f32 %v615_v55, 0.0  ;;  %v726_v62 = vmax.f32 %v655_v56, 0.0 }
 0x10b   : > { %v679_v63 = vmax.f32 %v538_v59, 0.0  ;;  %v695_v0 = vmax.f32 %v578_v60, 0.0 }
 0x10c   : > { %774 = vst [vmem:[%s1206_s14 + $0x158] sm:$0xff] %v710_v61 }
 0x10d   : > { %790 = vst [vmem:[%s1206_s14 + $0x1d8] sm:$0xff] %v726_v62 }
 0x10e   : > { %743 = vst [vmem:[%s1206_s14 + $0x60] sm:$0xff] %v679_v63 }
 0x10f   : > { %759 = vst [vmem:[%s1206_s14 + $0xe0] sm:$0xff] %v695_v0  ;;  %v617_v1 = vpop.f32.mrf.mxu2  ;;  %v657_v2 = vpop.f32.mrf.mxu3 }
 0x110   : > { %v618_v3 = vadd.f32 %v1198_v40, %v617_v1  ;;  %v658_v4 = vadd.f32 %v1198_v40, %v657_v2  ;;  %v539_v5 = vpop.f32.mrf.mxu0  ;;  %v579_v6 = vpop.f32.mrf.mxu1 }
 0x111   : > { %v540_v7 = vadd.f32 %v1198_v40, %v539_v5  ;;  %v580_v8 = vadd.f32 %v1198_v40, %v579_v6 }
 0x112   : > { %v711_v9 = vmax.f32 %v618_v3, 0.0  ;;  %v727_v10 = vmax.f32 %v658_v4, 0.0 }
 0x113   : > { %v680_v11 = vmax.f32 %v540_v7, 0.0  ;;  %v696_v12 = vmax.f32 %v580_v8, 0.0 }
 0x114   : > { %775 = vst [vmem:[%s1206_s14 + $0x160] sm:$0xff] %v711_v9 }
 0x115   : > { %791 = vst [vmem:[%s1206_s14 + $0x1e0] sm:$0xff] %v727_v10 }
 0x116   : > { %744 = vst [vmem:[%s1206_s14 + $0x68] sm:$0xff] %v680_v11 }
 0x117   : > { %760 = vst [vmem:[%s1206_s14 + $0xe8] sm:$0xff] %v696_v12  ;;  %v619_v13 = vpop.f32.mrf.mxu2  ;;  %v659_v14 = vpop.f32.mrf.mxu3 }
 0x118   : > { %v620_v15 = vadd.f32 %v1198_v40, %v619_v13  ;;  %v660_v16 = vadd.f32 %v1198_v40, %v659_v14  ;;  %v542_v17 = vpop.f32.mrf.mxu0  ;;  %v582_v18 = vpop.f32.mrf.mxu1 }
 0x119   : > { %v543_v19 = vadd.f32 %v1198_v40, %v542_v17  ;;  %v583_v20 = vadd.f32 %v1198_v40, %v582_v18 }
 0x11a   : > { %v712_v21 = vmax.f32 %v620_v15, 0.0  ;;  %v728_v22 = vmax.f32 %v660_v16, 0.0 }
 0x11b   : > { %v681_v23 = vmax.f32 %v543_v19, 0.0  ;;  %v697_v24 = vmax.f32 %v583_v20, 0.0 }
 0x11c   : > { %776 = vst [vmem:[%s1206_s14 + $0x168] sm:$0xff] %v712_v21 }
 0x11d   : > { %792 = vst [vmem:[%s1206_s14 + $0x1e8] sm:$0xff] %v728_v22 }
 0x11e   : > { %745 = vst [vmem:[%s1206_s14 + $0x70] sm:$0xff] %v681_v23 }
 0x11f   : > { %761 = vst [vmem:[%s1206_s14 + $0xf0] sm:$0xff] %v697_v24  ;;  %v622_v25 = vpop.f32.mrf.mxu2  ;;  %v662_v26 = vpop.f32.mrf.mxu3 }
 0x120   : > { %v623_v27 = vadd.f32 %v1198_v40, %v622_v25  ;;  %v663_v28 = vadd.f32 %v1198_v40, %v662_v26  ;;  %v544_v29 = vpop.f32.mrf.mxu0  ;;  %v584_v30 = vpop.f32.mrf.mxu1 }
 0x121   : > { %v545_v31 = vadd.f32 %v1198_v40, %v544_v29  ;;  %v585_v32 = vadd.f32 %v1198_v40, %v584_v30 }
 0x122   : > { %v713_v33 = vmax.f32 %v623_v27, 0.0  ;;  %v729_v34 = vmax.f32 %v663_v28, 0.0 }
 0x123   : > { %v682_v35 = vmax.f32 %v545_v31, 0.0  ;;  %v698_v36 = vmax.f32 %v585_v32, 0.0 }
 0x124   : > { %777 = vst [vmem:[%s1206_s14 + $0x170] sm:$0xff] %v713_v33 }
 0x125   : > { %793 = vst [vmem:[%s1206_s14 + $0x1f0] sm:$0xff] %v729_v34 }
 0x126   : > { %746 = vst [vmem:[%s1206_s14 + $0x78] sm:$0xff] %v682_v35 }
 0x127   : > { %762 = vst [vmem:[%s1206_s14 + $0xf8] sm:$0xff] %v698_v36  ;;  %v624_v37 = vpop.f32.mrf.mxu2  ;;  %v664_v38 = vpop.f32.mrf.mxu3 }
 0x128   : > { %v625_v39 = vadd.f32 %v1198_v40, %v624_v37  ;;  %v665_v41 = vadd.f32 %v1198_v40, %v664_v38 }
 0x12a   : > { %v714_v42 = vmax.f32 %v625_v39, 0.0  ;;  %v730_v43 = vmax.f32 %v665_v41, 0.0 }
 0x12c   : > { %778 = vst [vmem:[%s1206_s14 + $0x178] sm:$0xff] %v714_v42 }
 0x12d   : > { %794 = vst [vmem:[%s1206_s14 + $0x1f8] sm:$0xff] %v730_v43 }
 0x12e PF: > { %s13_s12 = sadd.s32 1, %s1101_s12  }
 0x12f   : > { %p10_p4 = scmp.ge.s32.totalorder %s13_s12, 6  }
 0x131   :  { %12 = sbr.rel (!%p10_p4) target bundleno = 1 (0x1), region = 62 }

// kernel: cnn_forward.7
= control target key start
LH: loop header
LB: loop body
LE: loop exit
PB: predicated region body
PF: predicated region fallthrough
CT: control target
= control target key end

     0   :  { %s1041_s1 = inlined_call_operand.vmem [shape: bf16[256,128], index: 1, kind: input, shape index: {}]   ;;  %s1042_s2 = inlined_call_operand.vmem [shape: f32[1,128], index: 2, kind: input, shape index: {}]   ;;  %s1043_s0 = inlined_call_operand.vmem [shape: bf16[200,256], index: 0, kind: input, shape index: {}]   ;;  %s1044_s3 = inlined_call_operand.vmem [shape: f32[200,128], index: 3, kind: output, shape index: {}]  }
   0x1   :  { %v689_v0 = vld [vmem:[%s1041_s1 + $0x38] sm:$0xff]  ;;  %v688_v2 = vld [vmem:[%s1041_s1 + $0x30] sm:$0xff]  ;;  %v687_v4 = vld [vmem:[%s1041_s1 + $0x28] sm:$0xff] }
   0x2   :  { %v697_v1 = vld [vmem:[%s1041_s1 + $0x78] sm:$0xff]  ;;  %298 = vmatpush.bf16.msra.mxu0 %v689_v0  ;;  %698 = vmatpush.bf16.msra.mxu2 %v689_v0  ;;  %v696_v3 = vld [vmem:[%s1041_s1 + $0x70] sm:$0xff]  ;;  %v695_v5 = vld [vmem:[%s1041_s1 + $0x68] sm:$0xff] }
   0x3   :  { %371 = vmatpush.bf16.msra.mxu1 %v697_v1  ;;  %706 = vmatpush.bf16.msra.mxu3 %v697_v1  ;;  %v686_v6 = vld [vmem:[%s1041_s1 + $0x20] sm:$0xff]  ;;  %v685_v8 = vld [vmem:[%s1041_s1 + $0x18] sm:$0xff]  ;;  %v684_v10 = vld [vmem:[%s1041_s1 + $0x10] sm:$0xff] }
   0x4   :  { %v694_v7 = vld [vmem:[%s1041_s1 + $0x60] sm:$0xff]  ;;  %v693_v9 = vld [vmem:[%s1041_s1 + $0x58] sm:$0xff]  ;;  %v692_v11 = vld [vmem:[%s1041_s1 + $0x50] sm:$0xff] }
   0x5   :  { %v683_v12 = vld [vmem:[%s1041_s1 + $0x8] sm:$0xff]  ;;  %v682_v14 = vld [vmem:[%s1041_s1] sm:$0xff]  ;;  %v672_v22 = vld [vmem:[%s1043_s0 + $0x74] sm:$0xf] }
   0x6   :  { %299 = vmatpush.bf16.msra.mxu0 %v688_v2  ;;  %699 = vmatpush.bf16.msra.mxu2 %v688_v2  ;;  %v691_v13 = vld [vmem:[%s1041_s1 + $0x48] sm:$0xff]  ;;  %v690_v15 = vld [vmem:[%s1041_s1 + $0x40] sm:$0xff]  ;;  %v558_v23 = vld [vmem:[%s1043_s0 + $0x78] sm:$0xf0] }
   0x7   :  { %372 = vmatpush.bf16.msra.mxu1 %v696_v3  ;;  %707 = vmatpush.bf16.msra.mxu3 %v696_v3  ;;  %v500_v16 = vld [vmem:[%s1043_s0] sm:$0xf]  ;;  %v659_v17 = vld [vmem:[%s1043_s0 + $0x4] sm:$0xf0]  ;;  %v658_v20 = vld [vmem:[%s1043_s0 + $0x4] sm:$0xf]  ;;  %v561_v27 = vor.u32 %v672_v22, %v558_v23 }
   0x8   :  { %v548_v18 = vld [vmem:[%s1043_s0 + $0x60] sm:$0xf]  ;;  %v671_v19 = vld [vmem:[%s1043_s0 + $0x64] sm:$0xf0]  ;;  %v502_v21 = vld [vmem:[%s1043_s0 + $0x8] sm:$0xf0]  ;;  %v501_v24 = vor.u32 %v659_v17, %v500_v16 }
   0x9   :  { %v549_v25 = vor.u32 %v671_v19, %v548_v18  ;;  %v505_v26 = vor.u32 %v658_v20, %v502_v21  ;;  %v508_v28 = vld [vmem:[%s1043_s0 + $0x10] sm:$0xf]  ;;  %v661_v29 = vld [vmem:[%s1043_s0 + $0x14] sm:$0xf0]  ;;  %v660_v32 = vld [vmem:[%s1043_s0 + $0x14] sm:$0xf] }
   0xa   :  { %300 = vmatpush.bf16.msra.mxu0 %v687_v4  ;;  %700 = vmatpush.bf16.msra.mxu2 %v687_v4  ;;  %v556_v30 = vld [vmem:[%s1043_s0 + $0x70] sm:$0xf]  ;;  %v673_v31 = vld [vmem:[%s1043_s0 + $0x74] sm:$0xf0]  ;;  %v510_v33 = vld [vmem:[%s1043_s0 + $0x18] sm:$0xf0]  ;;  %v509_v36 = vor.u32 %v661_v29, %v508_v28 }
   0xb   :  { %373 = vmatpush.bf16.msra.mxu1 %v695_v5  ;;  %708 = vmatpush.bf16.msra.mxu3 %v695_v5  ;;  %v674_v34 = vld [vmem:[%s1043_s0 + $0x84] sm:$0xf]  ;;  %v566_v35 = vld [vmem:[%s1043_s0 + $0x88] sm:$0xf0]  ;;  %v557_v37 = vor.u32 %v673_v31, %v556_v30  ;;  %v513_v38 = vor.u32 %v660_v32, %v510_v33  ;;  %v516_v40 = vld [vmem:[%s1043_s0 + $0x20] sm:$0xf] }
   0xc   :  { %v569_v39 = vor.u32 %v674_v34, %v566_v35  ;;  %v663_v41 = vld [vmem:[%s1043_s0 + $0x24] sm:$0xf0]  ;;  %v564_v42 = vld [vmem:[%s1043_s0 + $0x80] sm:$0xf]  ;;  %v662_v44 = vld [vmem:[%s1043_s0 + $0x24] sm:$0xf] }
   0xd   :  { %v675_v43 = vld [vmem:[%s1043_s0 + $0x84] sm:$0xf0]  ;;  %v518_v45 = vld [vmem:[%s1043_s0 + $0x28] sm:$0xf0]  ;;  %v676_v46 = vld [vmem:[%s1043_s0 + $0x94] sm:$0xf]  ;;  %v517_v48 = vor.u32 %v663_v41, %v516_v40 }
   0xe   :  { %301 = vmatpush.bf16.msra.mxu0 %v686_v6  ;;  %701 = vmatpush.bf16.msra.mxu2 %v686_v6  ;;  %v574_v47 = vld [vmem:[%s1043_s0 + $0x98] sm:$0xf0]  ;;  %v565_v49 = vor.u32 %v675_v43, %v564_v42  ;;  %v521_v50 = vor.u32 %v662_v44, %v518_v45  ;;  %v524_v52 = vld [vmem:[%s1043_s0 + $0x30] sm:$0xf]  ;;  %v665_v53 = vld [vmem:[%s1043_s0 + $0x34] sm:$0xf0] }
   0xf   :  { %374 = vmatpush.bf16.msra.mxu1 %v694_v7  ;;  %709 = vmatpush.bf16.msra.mxu3 %v694_v7  ;;  %v577_v51 = vor.u32 %v676_v46, %v574_v47  ;;  %v572_v54 = vld [vmem:[%s1043_s0 + $0x90] sm:$0xf]  ;;  %v677_v55 = vld [vmem:[%s1043_s0 + $0x94] sm:$0xf0]  ;;  %v664_v56 = vld [vmem:[%s1043_s0 + $0x34] sm:$0xf]  ;;  %v525_v60 = vor.u32 %v665_v53, %v524_v52 }
  0x10   :  { %v526_v57 = vld [vmem:[%s1043_s0 + $0x38] sm:$0xf0]  ;;  %v678_v58 = vld [vmem:[%s1043_s0 + $0xa4] sm:$0xf]  ;;  %v582_v59 = vld [vmem:[%s1043_s0 + $0xa8] sm:$0xf0]  ;;  %v573_v61 = vor.u32 %v677_v55, %v572_v54 }
  0x11   :  { %v529_v62 = vor.u32 %v664_v56, %v526_v57  ;;  %v585_v63 = vor.u32 %v678_v58, %v582_v59  ;;  %v532_v0 = vld [vmem:[%s1043_s0 + $0x40] sm:$0xf]  ;;  %v667_v1 = vld [vmem:[%s1043_s0 + $0x44] sm:$0xf0]  ;;  %v666_v4 = vld [vmem:[%s1043_s0 + $0x44] sm:$0xf] }
  0x12   :  { %302 = vmatpush.bf16.msra.mxu0 %v685_v8  ;;  %702 = vmatpush.bf16.msra.mxu2 %v685_v8  ;;  %v580_v2 = vld [vmem:[%s1043_s0 + $0xa0] sm:$0xf]  ;;  %v679_v3 = vld [vmem:[%s1043_s0 + $0xa4] sm:$0xf0]  ;;  %v534_v5 = vld [vmem:[%s1043_s0 + $0x48] sm:$0xf0]  ;;  %v533_v8 = vor.u32 %v667_v1, %v532_v0 }
  0x13   :  { %375 = vmatpush.bf16.msra.mxu1 %v693_v9  ;;  %710 = vmatpush.bf16.msra.mxu3 %v693_v9  ;;  %v680_v6 = vld [vmem:[%s1043_s0 + $0xb4] sm:$0xf]  ;;  %v590_v7 = vld [vmem:[%s1043_s0 + $0xb8] sm:$0xf0]  ;;  %v581_v9 = vor.u32 %v679_v3, %v580_v2  ;;  %v681_v16 = vld [vmem:[%s1043_s0 + $0xb4] sm:$0xf0] }
  0x14   :  { %v668_v18 = vld [vmem:[%s1043_s0 + $0x54] sm:$0xf]  ;;  %v542_v19 = vld [vmem:[%s1043_s0 + $0x58] sm:$0xf0]  ;;  %v933_v29 = vld [vmem:[%s1042_s2] ss:$0 sm:$0xff] }
  0x15   :  { %v545_v22 = vor.u32 %v668_v18, %v542_v19 }
  0x16   :  { %303 = vmatpush.bf16.msra.mxu0 %v684_v10  ;;  %703 = vmatpush.bf16.msra.mxu2 %v684_v10  ;;  %v537_v10 = vor.u32 %v666_v4, %v534_v5 }
  0x17   :  { %376 = vmatpush.bf16.msra.mxu1 %v692_v11  ;;  %711 = vmatpush.bf16.msra.mxu3 %v692_v11  ;;  %v593_v11 = vor.u32 %v680_v6, %v590_v7 }
  0x1a   :  { %304 = vmatpush.bf16.msra.mxu0 %v683_v12  ;;  %704 = vmatpush.bf16.msra.mxu2 %v683_v12  ;;  %v38_v12 = vld [vmem:[%s1043_s0 + $0xc0] sm:$0xff] }
  0x1b   :  { %377 = vmatpush.bf16.msra.mxu1 %v691_v13  ;;  %712 = vmatpush.bf16.msra.mxu3 %v691_v13  ;;  %v540_v13 = vld [vmem:[%s1043_s0 + $0x50] sm:$0xf]  ;;  %v149_v17 = vunpack.c.h.b16 %v38_v12 }
  0x1d   :  { %v175_v23 = vpack.c.b16 %v149_v17, %v149_v17 }
  0x1e   :  { %305 = vmatpush.bf16.msra.mxu0 %v682_v14  ;;  %705 = vmatpush.bf16.msra.mxu2 %v682_v14  ;;  %v669_v14 = vld [vmem:[%s1043_s0 + $0x54] sm:$0xf0] }
  0x1f   :  { %378 = vmatpush.bf16.msra.mxu1 %v690_v15  ;;  %713 = vmatpush.bf16.msra.mxu3 %v690_v15  ;;  %v588_v15 = vld [vmem:[%s1043_s0 + $0xb0] sm:$0xf]  ;;  %v541_v20 = vor.u32 %v669_v14, %v540_v13 }
  0x20   :  { %v589_v21 = vor.u32 %v681_v16, %v588_v15 }
  0x21   :  { %306 = vmatmul.bf16.vlgmr.msra.gmra.mxu0 %v501_v24  ;;  %336 = vmatmul.bf16.vlgmr.msra.gmra.mxu2 %v549_v25  ;;  %v148_v24 = vunpack.c.l.b16 %v38_v12  ;;  %v670_v25 = vld [vmem:[%s1043_s0 + $0x64] sm:$0xf] }
  0x22   :  { %379 = vmatmul.bf16.vlgmr.msra.gmra.mxu1 %v505_v26  ;;  %414 = vmatmul.bf16.vlgmr.msra.gmra.mxu3 %v561_v27  ;;  %v550_v26 = vld [vmem:[%s1043_s0 + $0x68] sm:$0xf0] }
  0x23   :  { %v174_v27 = vpack.c.b16 %v148_v24, %v148_v24  ;;  %v553_v28 = vor.u32 %v670_v25, %v550_v26 }
  0x31   :  { %311 = vmatmul.bf16.gmra.mxu0 %v509_v36  ;;  %341 = vmatmul.bf16.gmra.mxu2 %v557_v37 }
  0x32   :  { %384 = vmatmul.bf16.gmra.mxu1 %v513_v38  ;;  %419 = vmatmul.bf16.gmra.mxu3 %v569_v39 }
  0x41   :  { %316 = vmatmul.bf16.gmra.mxu0 %v517_v48  ;;  %346 = vmatmul.bf16.gmra.mxu2 %v565_v49 }
  0x42   :  { %389 = vmatmul.bf16.gmra.mxu1 %v521_v50  ;;  %424 = vmatmul.bf16.gmra.mxu3 %v577_v51 }
  0x51   :  { %321 = vmatmul.bf16.gmra.mxu0 %v525_v60  ;;  %351 = vmatmul.bf16.gmra.mxu2 %v573_v61 }
  0x52   :  { %394 = vmatmul.bf16.gmra.mxu1 %v529_v62  ;;  %429 = vmatmul.bf16.gmra.mxu3 %v585_v63 }
  0x61   :  { %326 = vmatmul.bf16.gmra.mxu0 %v533_v8  ;;  %356 = vmatmul.bf16.gmra.mxu2 %v581_v9 }
  0x62   :  { %399 = vmatmul.bf16.gmra.mxu1 %v537_v10  ;;  %434 = vmatmul.bf16.gmra.mxu3 %v593_v11 }
  0x71   :  { %331 = vmatmul.bf16.gmra.mxu0 %v541_v20  ;;  %361 = vmatmul.bf16.gmra.mxu2 %v589_v21 }
  0x72   :  { %404 = vmatmul.bf16.gmra.mxu1 %v545_v22  ;;  %439 = vmatmul.bf16.gmra.mxu3 %v175_v23 }
  0x81   :  { %366 = vmatmul.bf16.gmra.mxu2 %v174_v27 }
  0x82   :  { %409 = vmatmul.bf16.gmra.mxu1 %v553_v28 }
  0x9e   :  { %v307_v30 = vpop.f32.mrf.mxu0 }
  0x9f   :  { %v308_v31 = vadd.f32 %v933_v29, %v307_v30  ;;  %v380_v32 = vpop.f32.mrf.mxu1 }
  0xa1   :  { %v381_v33 = vadd.f32 %v380_v32, %v308_v31 }
  0xa3   :  { %v444_v34 = vmax.f32 %v381_v33, 0.0 }
  0xa4   :  { %v936_v35 = vpop.f32.mrf.mxu2 }
  0xa5   :  { %469 = vst [vmem:[%s1044_s3] sm:$0xff] %v444_v34  ;;  %v415_v36 = vpop.f32.mrf.mxu3 }
  0xa6   :  { %v309_v37 = vpop.f32.mrf.mxu0 }
  0xa7   :  { %v310_v38 = vadd.f32 %v933_v29, %v309_v37  ;;  %v382_v39 = vpop.f32.mrf.mxu1 }
  0xa9   :  { %v383_v40 = vadd.f32 %v382_v39, %v310_v38 }
  0xab   :  { %v445_v41 = vmax.f32 %v383_v40, 0.0 }
  0xac   :  { %v942_v42 = vpop.f32.mrf.mxu2 }
  0xad   :  { %470 = vst [vmem:[%s1044_s3 + $0x8] sm:$0xff] %v445_v41  ;;  %v417_v43 = vpop.f32.mrf.mxu3 }
  0xae   :  { %v312_v44 = vpop.f32.mrf.mxu0 }
  0xaf   :  { %v313_v45 = vadd.f32 %v933_v29, %v312_v44  ;;  %v385_v46 = vpop.f32.mrf.mxu1 }
  0xb1   :  { %v386_v47 = vadd.f32 %v385_v46, %v313_v45 }
  0xb3   :  { %v446_v48 = vmax.f32 %v386_v47, 0.0 }
  0xb4   :  { %v342_v49 = vpop.f32.mrf.mxu2 }
  0xb5   :  { %471 = vst [vmem:[%s1044_s3 + $0x10] sm:$0xff] %v446_v48  ;;  %v343_v50 = vadd.f32 %v933_v29, %v342_v49  ;;  %v420_v51 = vpop.f32.mrf.mxu3 }
  0xb6   :  { %v314_v52 = vpop.f32.mrf.mxu0 }
  0xb7   :  { %v416_v53 = vadd.f32 %v415_v36, %v343_v50  ;;  %v315_v54 = vadd.f32 %v933_v29, %v314_v52  ;;  %v387_v55 = vpop.f32.mrf.mxu1 }
  0xb9   :  { %v458_v56 = vmax.f32 %v416_v53, 0.0  ;;  %v388_v57 = vadd.f32 %v387_v55, %v315_v54 }
  0xbb   :  { %483 = vst [vmem:[%s1044_s3 + $0x70] sm:$0xff] %v458_v56  ;;  %v447_v58 = vmax.f32 %v388_v57, 0.0 }
  0xbc   :  { %v344_v59 = vpop.f32.mrf.mxu2 }
  0xbd   :  { %472 = vst [vmem:[%s1044_s3 + $0x18] sm:$0xff] %v447_v58  ;;  %v345_v60 = vadd.f32 %v933_v29, %v344_v59  ;;  %v422_v61 = vpop.f32.mrf.mxu3 }
  0xbe   :  { %v317_v62 = vpop.f32.mrf.mxu0 }
  0xbf   :  { %v418_v63 = vadd.f32 %v417_v43, %v345_v60  ;;  %v318_v0 = vadd.f32 %v933_v29, %v317_v62  ;;  %v390_v1 = vpop.f32.mrf.mxu1 }
  0xc1   :  { %v459_v2 = vmax.f32 %v418_v63, 0.0  ;;  %v391_v3 = vadd.f32 %v390_v1, %v318_v0 }
  0xc3   :  { %484 = vst [vmem:[%s1044_s3 + $0x78] sm:$0xff] %v459_v2  ;;  %v448_v4 = vmax.f32 %v391_v3, 0.0 }
  0xc4   :  { %v347_v5 = vpop.f32.mrf.mxu2 }
  0xc5   :  { %473 = vst [vmem:[%s1044_s3 + $0x20] sm:$0xff] %v448_v4  ;;  %v348_v6 = vadd.f32 %v933_v29, %v347_v5  ;;  %v425_v7 = vpop.f32.mrf.mxu3 }
  0xc6   :  { %v319_v8 = vpop.f32.mrf.mxu0 }
  0xc7   :  { %v421_v9 = vadd.f32 %v420_v51, %v348_v6  ;;  %v320_v10 = vadd.f32 %v933_v29, %v319_v8  ;;  %v392_v11 = vpop.f32.mrf.mxu1 }
  0xc9   :  { %v460_v12 = vmax.f32 %v421_v9, 0.0  ;;  %v393_v13 = vadd.f32 %v392_v11, %v320_v10 }
  0xcb   :  { %485 = vst [vmem:[%s1044_s3 + $0x80] sm:$0xff] %v460_v12  ;;  %v449_v14 = vmax.f32 %v393_v13, 0.0 }
  0xcc   :  { %v349_v15 = vpop.f32.mrf.mxu2 }
  0xcd   :  { %474 = vst [vmem:[%s1044_s3 + $0x28] sm:$0xff] %v449_v14  ;;  %v350_v16 = vadd.f32 %v933_v29, %v349_v15  ;;  %v427_v17 = vpop.f32.mrf.mxu3 }
  0xce   :  { %v322_v18 = vpop.f32.mrf.mxu0 }
  0xcf   :  { %v423_v19 = vadd.f32 %v422_v61, %v350_v16  ;;  %v323_v20 = vadd.f32 %v933_v29, %v322_v18  ;;  %v395_v21 = vpop.f32.mrf.mxu1 }
  0xd1   :  { %v461_v22 = vmax.f32 %v423_v19, 0.0  ;;  %v396_v23 = vadd.f32 %v395_v21, %v323_v20 }
  0xd3   :  { %486 = vst [vmem:[%s1044_s3 + $0x88] sm:$0xff] %v461_v22  ;;  %v450_v24 = vmax.f32 %v396_v23, 0.0 }
  0xd4   :  { %v352_v25 = vpop.f32.mrf.mxu2 }
  0xd5   :  { %475 = vst [vmem:[%s1044_s3 + $0x30] sm:$0xff] %v450_v24  ;;  %v353_v26 = vadd.f32 %v933_v29, %v352_v25  ;;  %v430_v27 = vpop.f32.mrf.mxu3  ;;  %v340_v25 = vadd.f32 %v933_v29, %v942_v42 }
  0xd6   :  { %v324_v28 = vpop.f32.mrf.mxu0 }
  0xd7   :  { %v426_v30 = vadd.f32 %v425_v7, %v353_v26  ;;  %v325_v31 = vadd.f32 %v933_v29, %v324_v28  ;;  %v397_v32 = vpop.f32.mrf.mxu1 }
  0xd9   :  { %v462_v33 = vmax.f32 %v426_v30, 0.0  ;;  %v398_v34 = vadd.f32 %v397_v32, %v325_v31 }
  0xdb   :  { %487 = vst [vmem:[%s1044_s3 + $0x90] sm:$0xff] %v462_v33  ;;  %v451_v36 = vmax.f32 %v398_v34, 0.0 }
  0xdc   :  { %v354_v37 = vpop.f32.mrf.mxu2 }
  0xdd   :  { %476 = vst [vmem:[%s1044_s3 + $0x38] sm:$0xff] %v451_v36  ;;  %v355_v38 = vadd.f32 %v933_v29, %v354_v37  ;;  %v432_v39 = vpop.f32.mrf.mxu3 }
  0xde   :  { %v327_v40 = vpop.f32.mrf.mxu0 }
  0xdf   :  { %v428_v41 = vadd.f32 %v427_v17, %v355_v38  ;;  %v328_v43 = vadd.f32 %v933_v29, %v327_v40  ;;  %v400_v44 = vpop.f32.mrf.mxu1  ;;  %v338_v17 = vadd.f32 %v933_v29, %v936_v35 }
  0xe1   :  { %v463_v45 = vmax.f32 %v428_v41, 0.0  ;;  %v401_v46 = vadd.f32 %v400_v44, %v328_v43 }
  0xe3   :  { %488 = vst [vmem:[%s1044_s3 + $0x98] sm:$0xff] %v463_v45  ;;  %v452_v47 = vmax.f32 %v401_v46, 0.0 }
  0xe4   :  { %v357_v48 = vpop.f32.mrf.mxu2 }
  0xe5   :  { %477 = vst [vmem:[%s1044_s3 + $0x40] sm:$0xff] %v452_v47  ;;  %v358_v49 = vadd.f32 %v933_v29, %v357_v48  ;;  %v435_v50 = vpop.f32.mrf.mxu3 }
  0xe6   :  { %v329_v51 = vpop.f32.mrf.mxu0 }
  0xe7   :  { %v431_v52 = vadd.f32 %v430_v27, %v358_v49  ;;  %v330_v53 = vadd.f32 %v933_v29, %v329_v51  ;;  %v402_v54 = vpop.f32.mrf.mxu1 }
  0xe9   :  { %v464_v55 = vmax.f32 %v431_v52, 0.0  ;;  %v403_v56 = vadd.f32 %v402_v54, %v330_v53 }
  0xeb   :  { %489 = vst [vmem:[%s1044_s3 + $0xa0] sm:$0xff] %v464_v55  ;;  %v453_v57 = vmax.f32 %v403_v56, 0.0 }
  0xec   :  { %v359_v58 = vpop.f32.mrf.mxu2 }
  0xed   :  { %478 = vst [vmem:[%s1044_s3 + $0x48] sm:$0xff] %v453_v57  ;;  %v360_v59 = vadd.f32 %v933_v29, %v359_v58  ;;  %v437_v60 = vpop.f32.mrf.mxu3 }
  0xee   :  { %v332_v61 = vpop.f32.mrf.mxu0 }
  0xef   :  { %v433_v62 = vadd.f32 %v432_v39, %v360_v59  ;;  %v333_v63 = vadd.f32 %v933_v29, %v332_v61  ;;  %v405_v0 = vpop.f32.mrf.mxu1 }
  0xf1   :  { %v465_v1 = vmax.f32 %v433_v62, 0.0  ;;  %v406_v2 = vadd.f32 %v405_v0, %v333_v63 }
  0xf3   :  { %490 = vst [vmem:[%s1044_s3 + $0xa8] sm:$0xff] %v465_v1  ;;  %v454_v3 = vmax.f32 %v406_v2, 0.0 }
  0xf4   :  { %v362_v4 = vpop.f32.mrf.mxu2 }
  0xf5   :  { %479 = vst [vmem:[%s1044_s3 + $0x50] sm:$0xff] %v454_v3  ;;  %v363_v5 = vadd.f32 %v933_v29, %v362_v4  ;;  %v440_v6 = vpop.f32.mrf.mxu3 }
  0xf6   :  { %v334_v7 = vpop.f32.mrf.mxu0 }
  0xf7   :  { %v436_v8 = vadd.f32 %v435_v50, %v363_v5  ;;  %v335_v9 = vadd.f32 %v933_v29, %v334_v7  ;;  %v407_v10 = vpop.f32.mrf.mxu1 }
  0xf9   :  { %v466_v11 = vmax.f32 %v436_v8, 0.0  ;;  %v408_v12 = vadd.f32 %v407_v10, %v335_v9 }
  0xfb   :  { %491 = vst [vmem:[%s1044_s3 + $0xb0] sm:$0xff] %v466_v11  ;;  %v455_v13 = vmax.f32 %v408_v12, 0.0 }
  0xfc   :  { %v364_v14 = vpop.f32.mrf.mxu2 }
  0xfd   :  { %480 = vst [vmem:[%s1044_s3 + $0x58] sm:$0xff] %v455_v13  ;;  %v365_v15 = vadd.f32 %v933_v29, %v364_v14  ;;  %v442_v16 = vpop.f32.mrf.mxu3 }
  0xff   :  { %v438_v18 = vadd.f32 %v437_v60, %v365_v15  ;;  %v410_v19 = vpop.f32.mrf.mxu1 }
 0x100   :  { %v411_v20 = vadd.f32 %v410_v19, %v338_v17 }
 0x101   :  { %v467_v21 = vmax.f32 %v438_v18, 0.0 }
 0x102   :  { %v456_v22 = vmax.f32 %v411_v20, 0.0 }
 0x103   :  { %492 = vst [vmem:[%s1044_s3 + $0xb8] sm:$0xff] %v467_v21 }
 0x104   :  { %481 = vst [vmem:[%s1044_s3 + $0x60] sm:$0xff] %v456_v22  ;;  %v367_v23 = vpop.f32.mrf.mxu2 }
 0x105   :  { %v368_v24 = vadd.f32 %v933_v29, %v367_v23 }
 0x107   :  { %v441_v35 = vadd.f32 %v440_v6, %v368_v24  ;;  %v412_v26 = vpop.f32.mrf.mxu1 }
 0x108   :  { %v413_v27 = vadd.f32 %v412_v26, %v340_v25 }
 0x109   :  { %v468_v28 = vmax.f32 %v441_v35, 0.0 }
 0x10a   :  { %v457_v30 = vmax.f32 %v413_v27, 0.0 }
 0x10b   :  { %493 = vst [vmem:[%s1044_s3 + $0xc0] sm:$0xff] %v468_v28 }
 0x10c   :  { %482 = vst [vmem:[%s1044_s3 + $0x68] sm:$0xff] %v457_v30  ;;  %v369_v31 = vpop.f32.mrf.mxu2 }

// kernel: cnn_forward.8
= control target key start
LH: loop header
LB: loop body
LE: loop exit
PB: predicated region body
PF: predicated region fallthrough
CT: control target
= control target key end

     0   :  { %s207_s0 = inlined_call_operand.vmem [shape: f32[56,128], index: 0, kind: input, shape index: {}]   ;;  %s208_s1 = inlined_call_operand.vmem [shape: f32[56,128], index: 1, kind: input, shape index: {}]   ;;  %s209_s2 = inlined_call_operand.vmem [shape: f32[56,128], index: 2, kind: input, shape index: {}]   ;;  %s210_s3 = inlined_call_operand.vmem [shape: f32[56,128], index: 3, kind: input, shape index: {}]   ;;  %s211_s4 = inlined_call_operand.vmem [shape: f32[56,128], index: 4, kind: output, shape index: {}]  }
   0x1   :  { %v17_v0 = vld [vmem:[%s207_s0] sm:$0xff]  ;;  %v18_v5 = vld [vmem:[%s207_s0 + $0x8] sm:$0xff]  ;;  %v19_v11 = vld [vmem:[%s207_s0 + $0x10] sm:$0xff] }
   0x2   :  { %v24_v1 = vld [vmem:[%s208_s1] sm:$0xff]  ;;  %v25_v6 = vld [vmem:[%s208_s1 + $0x8] sm:$0xff]  ;;  %v26_v13 = vld [vmem:[%s208_s1 + $0x10] sm:$0xff] }
   0x3   :  { %v38_v2 = vld [vmem:[%s209_s2] sm:$0xff]  ;;  %v31_v3 = vmax.f32 %v17_v0, %v24_v1  ;;  %v32_v8 = vmax.f32 %v18_v5, %v25_v6  ;;  %v39_v9 = vld [vmem:[%s209_s2 + $0x8] sm:$0xff]  ;;  %v40_v14 = vld [vmem:[%s209_s2 + $0x10] sm:$0xff]  ;;  %v33_v17 = vmax.f32 %v19_v11, %v26_v13 }
   0x4   :  { %v45_v4 = vld [vmem:[%s210_s3] sm:$0xff]  ;;  %v46_v10 = vld [vmem:[%s210_s3 + $0x8] sm:$0xff]  ;;  %v47_v15 = vld [vmem:[%s210_s3 + $0x10] sm:$0xff] }
   0x5   :  { %v52_v7 = vmax.f32 %v38_v2, %v45_v4  ;;  %v53_v12 = vmax.f32 %v39_v9, %v46_v10  ;;  %v54_v18 = vmax.f32 %v40_v14, %v47_v15  ;;  %v20_v19 = vld [vmem:[%s207_s0 + $0x18] sm:$0xff]  ;;  %v21_v25 = vld [vmem:[%s207_s0 + $0x20] sm:$0xff]  ;;  %v22_v32 = vld [vmem:[%s207_s0 + $0x28] sm:$0xff] }
   0x6   :  { %v27_v20 = vld [vmem:[%s208_s1 + $0x18] sm:$0xff]  ;;  %v28_v26 = vld [vmem:[%s208_s1 + $0x20] sm:$0xff]  ;;  %v29_v34 = vld [vmem:[%s208_s1 + $0x28] sm:$0xff] }
   0x7   :  { %v59_v16 = vmax.f32 %v31_v3, %v52_v7  ;;  %v41_v21 = vld [vmem:[%s209_s2 + $0x18] sm:$0xff]  ;;  %v60_v22 = vmax.f32 %v32_v8, %v53_v12  ;;  %v34_v23 = vmax.f32 %v20_v19, %v27_v20  ;;  %v61_v27 = vmax.f32 %v33_v17, %v54_v18  ;;  %v42_v30 = vld [vmem:[%s209_s2 + $0x20] sm:$0xff]  ;;  %v43_v35 = vld [vmem:[%s209_s2 + $0x28] sm:$0xff] }
   0x8   :  { %v48_v24 = vld [vmem:[%s210_s3 + $0x18] sm:$0xff]  ;;  %v35_v29 = vmax.f32 %v21_v25, %v28_v26  ;;  %v49_v31 = vld [vmem:[%s210_s3 + $0x20] sm:$0xff]  ;;  %v50_v36 = vld [vmem:[%s210_s3 + $0x28] sm:$0xff]  ;;  %v36_v38 = vmax.f32 %v22_v32, %v29_v34 }
   0x9   :  { %66 = vst [vmem:[%s211_s4] sm:$0xff] %v59_v16  ;;  %v55_v28 = vmax.f32 %v41_v21, %v48_v24  ;;  %v56_v33 = vmax.f32 %v42_v30, %v49_v31  ;;  %v57_v39 = vmax.f32 %v43_v35, %v50_v36  ;;  %v23_v40 = vld [vmem:[%s207_s0 + $0x30] sm:$0xff] }
   0xa   :  { %67 = vst [vmem:[%s211_s4 + $0x8] sm:$0xff] %v60_v22  ;;  %v30_v41 = vld [vmem:[%s208_s1 + $0x30] sm:$0xff] }
   0xb   :  { %68 = vst [vmem:[%s211_s4 + $0x10] sm:$0xff] %v61_v27  ;;  %v62_v37 = vmax.f32 %v34_v23, %v55_v28  ;;  %v44_v42 = vld [vmem:[%s209_s2 + $0x30] sm:$0xff]  ;;  %v63_v43 = vmax.f32 %v35_v29, %v56_v33  ;;  %v37_v44 = vmax.f32 %v23_v40, %v30_v41  ;;  %v64_v46 = vmax.f32 %v36_v38, %v57_v39 }
   0xc   :  { %v51_v45 = vld [vmem:[%s210_s3 + $0x30] sm:$0xff] }
   0xd   :  { %69 = vst [vmem:[%s211_s4 + $0x18] sm:$0xff] %v62_v37  ;;  %v58_v47 = vmax.f32 %v44_v42, %v51_v45 }
   0xe   :  { %70 = vst [vmem:[%s211_s4 + $0x20] sm:$0xff] %v63_v43 }
   0xf   :  { %71 = vst [vmem:[%s211_s4 + $0x28] sm:$0xff] %v64_v46  ;;  %v65_v48 = vmax.f32 %v37_v44, %v58_v47 }
  0x11   :  { %72 = vst [vmem:[%s211_s4 + $0x30] sm:$0xff] %v65_v48 }

// kernel: cnn_forward.9
= control target key start
LH: loop header
LB: loop body
LE: loop exit
PB: predicated region body
PF: predicated region fallthrough
CT: control target
= control target key end

     0   :  { %s970_s1 = inlined_call_operand.vmem [shape: bf16[512,128], index: 1, kind: input, shape index: {}]   ;;  %s971_s2 = inlined_call_operand.vmem [shape: f32[1,128], index: 2, kind: input, shape index: {}]   ;;  %s972_s0 = inlined_call_operand.vmem [shape: bf16[8,512], index: 0, kind: input, shape index: {}]   ;;  %s973_s3 = inlined_call_operand.vmem [shape: bf16[128,128], index: 3, kind: input, shape index: {}]   ;;  %s974_s4 = inlined_call_operand.vmem [shape: f32[1,128], index: 4, kind: input, shape index: {}]   ;;  %s975_s5 = inlined_call_operand.vmem [shape: bf16[128,128], index: 5, kind: input, shape index: {}]   ;;  %s976_s6 = inlined_call_operand.vmem [shape: f32[1,128], index: 6, kind: input, shape index: {}]   ;;  %s977_s7 = inlined_call_operand.vmem [shape: f32[8,128], index: 7, kind: output, shape index: {}]  }
   0x1   :  { %v724_v0 = vld [vmem:[%s970_s1 + $0x38] sm:$0xff]  ;;  %v723_v4 = vld [vmem:[%s970_s1 + $0x30] sm:$0xff]  ;;  %v722_v8 = vld [vmem:[%s970_s1 + $0x28] sm:$0xff] }
   0x2   :  { %v732_v1 = vld [vmem:[%s970_s1 + $0x78] sm:$0xff]  ;;  %302 = vmatpush.bf16.msra.mxu0 %v724_v0  ;;  %v731_v5 = vld [vmem:[%s970_s1 + $0x70] sm:$0xff]  ;;  %v730_v9 = vld [vmem:[%s970_s1 + $0x68] sm:$0xff] }
   0x3   :  { %v740_v2 = vld [vmem:[%s970_s1 + $0xb8] sm:$0xff]  ;;  %315 = vmatpush.bf16.msra.mxu1 %v732_v1  ;;  %v739_v6 = vld [vmem:[%s970_s1 + $0xb0] sm:$0xff]  ;;  %v738_v10 = vld [vmem:[%s970_s1 + $0xa8] sm:$0xff] }
   0x4   :  { %v748_v3 = vld [vmem:[%s970_s1 + $0xf8] sm:$0xff]  ;;  %328 = vmatpush.bf16.msra.mxu2 %v740_v2  ;;  %v747_v7 = vld [vmem:[%s970_s1 + $0xf0] sm:$0xff]  ;;  %v746_v11 = vld [vmem:[%s970_s1 + $0xe8] sm:$0xff] }
   0x5   :  { %341 = vmatpush.bf16.msra.mxu3 %v748_v3  ;;  %v721_v12 = vld [vmem:[%s970_s1 + $0x20] sm:$0xff]  ;;  %v720_v16 = vld [vmem:[%s970_s1 + $0x18] sm:$0xff]  ;;  %v719_v20 = vld [vmem:[%s970_s1 + $0x10] sm:$0xff] }
   0x6   :  { %303 = vmatpush.bf16.msra.mxu0 %v723_v4  ;;  %v729_v13 = vld [vmem:[%s970_s1 + $0x60] sm:$0xff]  ;;  %v728_v17 = vld [vmem:[%s970_s1 + $0x58] sm:$0xff]  ;;  %v727_v21 = vld [vmem:[%s970_s1 + $0x50] sm:$0xff] }
   0x7   :  { %316 = vmatpush.bf16.msra.mxu1 %v731_v5  ;;  %v737_v14 = vld [vmem:[%s970_s1 + $0xa0] sm:$0xff]  ;;  %v736_v18 = vld [vmem:[%s970_s1 + $0x98] sm:$0xff]  ;;  %v735_v22 = vld [vmem:[%s970_s1 + $0x90] sm:$0xff] }
   0x8   :  { %329 = vmatpush.bf16.msra.mxu2 %v739_v6  ;;  %v745_v15 = vld [vmem:[%s970_s1 + $0xe0] sm:$0xff]  ;;  %v744_v19 = vld [vmem:[%s970_s1 + $0xd8] sm:$0xff]  ;;  %v743_v23 = vld [vmem:[%s970_s1 + $0xd0] sm:$0xff] }
   0x9   :  { %342 = vmatpush.bf16.msra.mxu3 %v747_v7  ;;  %v718_v24 = vld [vmem:[%s970_s1 + $0x8] sm:$0xff]  ;;  %v26_v26 = vld [vmem:[%s972_s0] sm:$0xff]  ;;  %v756_v38 = vld [vmem:[%s973_s3 + $0x38] sm:$0xff] }
   0xa   :  { %304 = vmatpush.bf16.msra.mxu0 %v722_v8  ;;  %v726_v25 = vld [vmem:[%s970_s1 + $0x48] sm:$0xff]  ;;  %v98_v30 = vunpack.c.l.b16 %v26_v26  ;;  %v99_v31 = vunpack.c.h.b16 %v26_v26  ;;  %v717_v32 = vld [vmem:[%s970_s1] sm:$0xff]  ;;  %v755_v43 = vld [vmem:[%s973_s3 + $0x30] sm:$0xff] }
   0xb   :  { %317 = vmatpush.bf16.msra.mxu1 %v730_v9  ;;  %v734_v27 = vld [vmem:[%s970_s1 + $0x88] sm:$0xff]  ;;  %v725_v33 = vld [vmem:[%s970_s1 + $0x40] sm:$0xff]  ;;  %v752_v46 = vld [vmem:[%s973_s3 + $0x18] sm:$0xff] }
   0xc   :  { %330 = vmatpush.bf16.msra.mxu2 %v738_v10  ;;  %v742_v28 = vld [vmem:[%s970_s1 + $0xc8] sm:$0xff]  ;;  %v733_v36 = vld [vmem:[%s970_s1 + $0x80] sm:$0xff]  ;;  %v102_v39 = vpack.c.b16 %v98_v30, %v98_v30  ;;  %v103_v40 = vpack.c.b16 %v99_v31, %v99_v31  ;;  %v751_v47 = vld [vmem:[%s973_s3 + $0x10] sm:$0xff] }
   0xd   :  { %343 = vmatpush.bf16.msra.mxu3 %v746_v11  ;;  %v27_v29 = vld [vmem:[%s972_s0 + $0x8] sm:$0xff]  ;;  %v741_v37 = vld [vmem:[%s970_s1 + $0xc0] sm:$0xff]  ;;  %v764_v50 = vld [vmem:[%s975_s5 + $0x38] sm:$0xff] }
   0xe   :  { %305 = vmatpush.bf16.msra.mxu0 %v721_v12  ;;  %v100_v34 = vunpack.c.l.b16 %v27_v29  ;;  %v101_v35 = vunpack.c.h.b16 %v27_v29  ;;  %v754_v44 = vld [vmem:[%s973_s3 + $0x28] sm:$0xff]  ;;  %v753_v45 = vld [vmem:[%s973_s3 + $0x20] sm:$0xff]  ;;  %v763_v51 = vld [vmem:[%s975_s5 + $0x30] sm:$0xff] }
   0xf   :  { %318 = vmatpush.bf16.msra.mxu1 %v729_v13  ;;  %v750_v48 = vld [vmem:[%s973_s3 + $0x8] sm:$0xff]  ;;  %v749_v49 = vld [vmem:[%s973_s3] sm:$0xff]  ;;  %v760_v55 = vld [vmem:[%s975_s5 + $0x18] sm:$0xff] }
  0x10   :  { %331 = vmatpush.bf16.msra.mxu2 %v737_v14  ;;  %v104_v41 = vpack.c.b16 %v100_v34, %v100_v34  ;;  %v105_v42 = vpack.c.b16 %v101_v35, %v101_v35  ;;  %v762_v52 = vld [vmem:[%s975_s5 + $0x28] sm:$0xff]  ;;  %v761_v53 = vld [vmem:[%s975_s5 + $0x20] sm:$0xff]  ;;  %v759_v59 = vld [vmem:[%s975_s5 + $0x10] sm:$0xff] }
  0x11   :  { %344 = vmatpush.bf16.msra.mxu3 %v745_v15  ;;  %v765_v54 = vld [vmem:[%s971_s2] ss:$0 sm:$0xff]  ;;  %v758_v7 = vld [vmem:[%s975_s5 + $0x8] sm:$0xff] }
  0x12   :  { %306 = vmatpush.bf16.msra.mxu0 %v720_v16  ;;  %v757_v8 = vld [vmem:[%s975_s5] sm:$0xff] }
  0x13   :  { %319 = vmatpush.bf16.msra.mxu1 %v728_v17  ;;  %v766_v9 = vld [vmem:[%s974_s4] ss:$0 sm:$0xff] }
  0x14   :  { %332 = vmatpush.bf16.msra.mxu2 %v736_v18  ;;  %v767_v15 = vld [vmem:[%s976_s6] ss:$0 sm:$0xff] }
  0x15   :  { %345 = vmatpush.bf16.msra.mxu3 %v744_v19 }
  0x16   :  { %307 = vmatpush.bf16.msra.mxu0 %v719_v20 }
  0x17   :  { %320 = vmatpush.bf16.msra.mxu1 %v727_v21 }
  0x18   :  { %333 = vmatpush.bf16.msra.mxu2 %v735_v22 }
  0x19   :  { %346 = vmatpush.bf16.msra.mxu3 %v743_v23 }
  0x1a   :  { %308 = vmatpush.bf16.msra.mxu0 %v718_v24 }
  0x1b   :  { %321 = vmatpush.bf16.msra.mxu1 %v726_v25 }
  0x1c   :  { %334 = vmatpush.bf16.msra.mxu2 %v734_v27 }
  0x1d   :  { %347 = vmatpush.bf16.msra.mxu3 %v742_v28 }
  0x1e   :  { %309 = vmatpush.bf16.msra.mxu0 %v717_v32 }
  0x1f   :  { %322 = vmatpush.bf16.msra.mxu1 %v725_v33 }
  0x20   :  { %335 = vmatpush.bf16.msra.mxu2 %v733_v36 }
  0x21   :  { %348 = vmatpush.bf16.msra.mxu3 %v741_v37  ;;  %310 = vmatmul.bf16.vlgmr.msra.gmra.mxu0 %v102_v39 }
  0x22   :  { %424 = vmatpush.bf16.msrb.mxu0 %v756_v38  ;;  %323 = vmatmul.bf16.vlgmr.msra.gmra.mxu1 %v103_v40 }
  0x23   :  { %336 = vmatmul.bf16.vlgmr.msra.gmra.mxu2 %v104_v41  ;;  %507 = vmatpush.bf16.msrb.mxu1 %v764_v50 }
  0x24   :  { %349 = vmatmul.bf16.vlgmr.msra.gmra.mxu3 %v105_v42 }
  0x26   :  { %425 = vmatpush.bf16.msrb.mxu0 %v755_v43 }
  0x27   :  { %508 = vmatpush.bf16.msrb.mxu1 %v763_v51 }
  0x2a   :  { %426 = vmatpush.bf16.msrb.mxu0 %v754_v44 }
  0x2b   :  { %509 = vmatpush.bf16.msrb.mxu1 %v762_v52 }
  0x2e   :  { %427 = vmatpush.bf16.msrb.mxu0 %v753_v45 }
  0x2f   :  { %510 = vmatpush.bf16.msrb.mxu1 %v761_v53 }
  0x32   :  { %428 = vmatpush.bf16.msrb.mxu0 %v752_v46 }
  0x33   :  { %511 = vmatpush.bf16.msrb.mxu1 %v760_v55 }
  0x36   :  { %429 = vmatpush.bf16.msrb.mxu0 %v751_v47 }
  0x37   :  { %512 = vmatpush.bf16.msrb.mxu1 %v759_v59 }
  0x3a   :  { %430 = vmatpush.bf16.msrb.mxu0 %v750_v48 }
  0x3b   :  { %513 = vmatpush.bf16.msrb.mxu1 %v758_v7 }
  0x3e   :  { %431 = vmatpush.bf16.msrb.mxu0 %v749_v49 }
  0x3f   :  { %514 = vmatpush.bf16.msrb.mxu1 %v757_v8 }
  0x9e   :  { %v311_v56 = vpop.f32.mrf.mxu0 }
  0x9f   :  { %v324_v57 = vpop.f32.mrf.mxu1  ;;  %v312_v58 = vadd.f32 %v765_v54, %v311_v56 }
  0xa1   :  { %v325_v60 = vadd.f32 %v324_v57, %v312_v58 }
  0xa6   :  { %v337_v61 = vpop.f32.mrf.mxu2  ;;  %v313_v0 = vpop.f32.mrf.mxu0 }
  0xa7   :  { %v350_v62 = vpop.f32.mrf.mxu3  ;;  %v338_v63 = vadd.f32 %v337_v61, %v325_v60  ;;  %v326_v1 = vpop.f32.mrf.mxu1 }
  0xa9   :  { %v351_v2 = vadd.f32 %v350_v62, %v338_v63 }
  0xab   :  { %v354_v3 = vmax.f32 %v351_v2, 0.0 }
  0xad   :  { %v355_v4 = vpack.c.bf16 %v354_v3, %v354_v3 }
  0xae   :  { %v339_v5 = vpop.f32.mrf.mxu2 }
  0xaf   :  { %v352_v6 = vpop.f32.mrf.mxu3  ;;  %432 = vmatmul.bf16.vlgmr.msrb.gmra.mxu0 %v355_v4 }
 0x12c   :  { %v433_v10 = vpop.f32.mrf.mxu0 }
 0x12d   :  { %v434_v11 = vadd.f32 %v766_v9, %v433_v10 }
 0x12f   :  { %v437_v12 = vmax.f32 %v434_v11, 0.0 }
 0x131   :  { %v438_v13 = vpack.c.bf16 %v437_v12, %v437_v12 }
 0x133   :  { %515 = vmatmul.bf16.vlgmr.msrb.gmra.mxu1 %v438_v13 }
 0x134   :  { %v435_v14 = vpop.f32.mrf.mxu0 }
 0x1b0   :  { %v516_v16 = vpop.f32.mrf.mxu1 }
 0x1b1   :  { %v517_v17 = vadd.f32 %v767_v15, %v516_v16 }
 0x1b3   :  { %520 = vst [vmem:[%s977_s7] sm:$0xff] %v517_v17 }
 0x1b8   :  { %v518_v18 = vpop.f32.mrf.mxu1 }

</bundles_post_ra>
